<compile_context>
chip_gen: v6e
topology: v6e:2x2x1
jax: 0.10.0
libtpu: 0.0.40
codegen_flags: <defaults>
</compile_context>

<pallas_src>
import functools
import math

import jax
import jax.numpy as jnp
from jax.experimental import pallas as pl
from jax.experimental.pallas import tpu as pltpu


def _layer_norm(x, gamma, beta, eps=1e-5):
    # x: (S, E) f32, gamma/beta: (1, E). Biased variance, matching nn.LayerNorm.
    mu = jnp.mean(x, axis=-1, keepdims=True)
    xc = x - mu
    var = jnp.mean(xc * xc, axis=-1, keepdims=True)
    return xc * jax.lax.rsqrt(var + eps) * gamma + beta


def _gelu_exact(x):
    # PyTorch nn.GELU() default = exact erf formulation.
    return 0.5 * x * (1.0 + jax.lax.erf(x * (1.0 / math.sqrt(2.0))))


def _softmax_lastdim(s):
    m = jnp.max(s, axis=-1, keepdims=True)
    e = jnp.exp(s - m)
    return e * pl.reciprocal(jnp.sum(e, axis=-1, keepdims=True), approx=True)


def attention_block_kernel(x_ref, ln1g_ref, ln1b_ref,
                           wq_ref, wk_ref, wv_ref,
                           bq_ref, bk_ref, bv_ref,
                           wo_ref, bo_ref,
                           ln2g_ref, ln2b_ref,
                           w1_ref, b1_ref, w2_ref, b2_ref,
                           o_ref, *, num_heads):
    f32 = jnp.float32
    cdt = wq_ref.dtype              # MXU operand dtype (bf16 by default, f32 for checking)

    x = x_ref[0]                    # (S, E) f32 — one batch element per grid step
    S, E = x.shape
    NH = num_heads
    d = E // NH
    scale = 1.0 / math.sqrt(d)

    # ---- LayerNorm 1 (f32) ----
    inp = _layer_norm(x, ln1g_ref[...], ln1b_ref[...])

    # ---- QKV projection, heads batched on the MXU (weights already (NH, E, d)) ----
    inp_b = jnp.broadcast_to(inp.astype(cdt)[None], (NH, S, E))      # hoisted once
    q = jnp.einsum("hse,hed->hsd", inp_b, wq_ref[...], preferred_element_type=f32)
    k = jnp.einsum("hse,hed->hsd", inp_b, wk_ref[...], preferred_element_type=f32)
    v = jnp.einsum("hse,hed->hsd", inp_b, wv_ref[...], preferred_element_type=f32)
    q = (q + bq_ref[...]) * scale
    k = k + bk_ref[...]
    v = v + bv_ref[...]

    # ---- scaled dot-product attention (softmax kept in f32) ----
    scores = jnp.einsum("hqd,hkd->hqk", q.astype(cdt), k.astype(cdt),
                        preferred_element_type=f32)                  # (NH, S, S)
    probs = _softmax_lastdim(scores)
    ctx = jnp.einsum("hqk,hkd->hqd", probs.astype(cdt), v.astype(cdt),
                     preferred_element_type=f32)                     # (NH, S, d)

    # ---- output projection: per-head partials summed (no concat, no lane slicing) ----
    partial = jnp.einsum("hsd,hde->hse", ctx.astype(cdt), wo_ref[...],
                         preferred_element_type=f32)                 # (NH, S, E)
    attn_out = jnp.sum(partial, axis=0) + bo_ref[...]

    # ---- residual 1 ----
    x1 = x + attn_out

    # ---- LayerNorm 2 + MLP (weights already pre-transposed: (E,H) and (H,E)) ----
    ln2 = _layer_norm(x1, ln2g_ref[...], ln2b_ref[...])
    h1 = jnp.dot(ln2.astype(cdt), w1_ref[...], preferred_element_type=f32) + b1_ref[...]
    g = _gelu_exact(h1)
    mlp_out = jnp.dot(g.astype(cdt), w2_ref[...], preferred_element_type=f32) + b2_ref[...]

    # ---- residual 2 ----
    o_ref[0] = (x1 + mlp_out).astype(o_ref.dtype)


def prepare_params(params, num_heads, compute_dtype=jnp.bfloat16):
    """One-time wrapper-side layout plumbing: transpose + head-major weights, bf16 cast."""
    E = params["ln1_g"].shape[-1]
    assert E % num_heads == 0, "embed_dim must be divisible by num_heads"
    d = E // num_heads

    wqkv = params["wqkv"]                       # (3E, E) — PyTorch in_proj_weight layout
    bqkv = params["bqkv"].reshape(3 * E)
    wq, wk, wv = wqkv[:E], wqkv[E:2 * E], wqkv[2 * E:]

    def headify(w):                             # (E, E) -> (NH, E, d): rhs for inp @ w_h
        return jnp.transpose(w.reshape(num_heads, d, E), (0, 2, 1)).astype(compute_dtype)

    f32 = jnp.float32
    return {
        "ln1_g": params["ln1_g"].astype(f32), "ln1_b": params["ln1_b"].astype(f32),
        "wq": headify(wq), "wk": headify(wk), "wv": headify(wv),
        "bq": bqkv[:E].reshape(num_heads, 1, d).astype(f32),
        "bk": bqkv[E:2 * E].reshape(num_heads, 1, d).astype(f32),
        "bv": bqkv[2 * E:].reshape(num_heads, 1, d).astype(f32),
        "wo": params["wo"].T.reshape(num_heads, d, E).astype(compute_dtype),  # (NH, d, E)
        "bo": params["bo"].astype(f32),
        "ln2_g": params["ln2_g"].astype(f32), "ln2_b": params["ln2_b"].astype(f32),
        "w1t": params["w1"].T.astype(compute_dtype),   # (E, H)
        "b1": params["b1"].astype(f32),
        "w2t": params["w2"].T.astype(compute_dtype),   # (H, E)
        "b2": params["b2"].astype(f32),
    }


def attention_block(x, prep, num_heads, *, single_buffer_weights=True,
                    vmem_limit_bytes=64 * 1024 * 1024):
    """x: (S, B, E) f32.  Returns (S, B, E) f32."""
    S, B, E = x.shape
    NH = num_heads
    d = E // NH
    H = prep["w1t"].shape[1]

    x_bse = jnp.transpose(x, (1, 0, 2))             # (B, S, E): one sequence per program

    def const_spec(shape, single_buffer):
        index_map = lambda b: (0,) * len(shape)
        if single_buffer:
            # Weights are grid-invariant: no need to double-buffer them in VMEM.
            return pl.BlockSpec(shape, index_map, pipeline_mode=pl.Buffered(1))
        return pl.BlockSpec(shape, index_map)

    w = lambda shape: const_spec(shape, single_buffer_weights)
    c = lambda shape: const_spec(shape, False)

    in_specs = [
        pl.BlockSpec((1, S, E), lambda b: (b, 0, 0)),   # x
        c((1, E)), c((1, E)),                           # ln1 gamma/beta
        w((NH, E, d)), w((NH, E, d)), w((NH, E, d)),    # wq, wk, wv (head-major)
        c((NH, 1, d)), c((NH, 1, d)), c((NH, 1, d)),    # bq, bk, bv
        w((NH, d, E)), c((1, E)),                       # wo (head-major), bo
        c((1, E)), c((1, E)),                           # ln2 gamma/beta
        w((E, H)), c((1, H)),                           # w1^T, b1
        w((H, E)), c((1, E)),                           # w2^T, b2
    ]

    out = pl.pallas_call(
        functools.partial(attention_block_kernel, num_heads=num_heads),
        out_shape=jax.ShapeDtypeStruct((B, S, E), x.dtype),
        grid_spec=pltpu.PrefetchScalarGridSpec(
            num_scalar_prefetch=0,
            grid=(B,),
            in_specs=in_specs,
            out_specs=pl.BlockSpec((1, S, E), lambda b: (b, 0, 0)),
        ),
        compiler_params=pltpu.CompilerParams(
            dimension_semantics=("parallel",),
            vmem_limit_bytes=vmem_limit_bytes,
        ),
    )(x_bse,
      prep["ln1_g"], prep["ln1_b"],
      prep["wq"], prep["wk"], prep["wv"],
      prep["bq"], prep["bk"], prep["bv"],
      prep["wo"], prep["bo"],
      prep["ln2_g"], prep["ln2_b"],
      prep["w1t"], prep["b1"],
      prep["w2t"], prep["b2"])

    return jnp.transpose(out, (1, 0, 2))            # back to (S, B, E)


def attention_block_ref(x, params, num_heads):
    """Pure-JAX f32 reference (same math, no Pallas) for validation."""
    S, B, E = x.shape
    d = E // num_heads
    scale = 1.0 / math.sqrt(d)

    def ln(v, g, b):
        mu = jnp.mean(v, axis=-1, keepdims=True)
        var = jnp.mean((v - mu) ** 2, axis=-1, keepdims=True)
        return (v - mu) * jax.lax.rsqrt(var + 1e-5) * g + b

    inp = ln(x, params["ln1_g"], params["ln1_b"])
    qkv = jnp.einsum("sbe,fe->sbf", inp, params["wqkv"]) + params["bqkv"]
    q, k, v = jnp.split(qkv, 3, axis=-1)
    q = q * scale
    qh = q.reshape(S, B, num_heads, d)
    kh = k.reshape(S, B, num_heads, d)
    vh = v.reshape(S, B, num_heads, d)
    scores = jnp.einsum("sbhd,tbhd->bhst", qh, kh)
    probs = jax.nn.softmax(scores, axis=-1)
    ctx = jnp.einsum("bhst,tbhd->sbhd", probs, vh).reshape(S, B, E)
    attn = jnp.einsum("sbe,fe->sbf", ctx, params["wo"]) + params["bo"]
    x1 = x + attn
    l2 = ln(x1, params["ln2_g"], params["ln2_b"])
    h1 = jnp.einsum("sbe,he->sbh", l2, params["w1"]) + params["b1"]
    g = 0.5 * h1 * (1.0 + jax.lax.erf(h1 / math.sqrt(2.0)))
    mlp = jnp.einsum("sbh,eh->sbe", g, params["w2"]) + params["b2"]
    return x1 + mlp


def init_params(key, embed_dim, hidden_dim):
    E, H = embed_dim, hidden_dim
    ks = jax.random.split(key, 4)
    std = 0.02
    return {
        "ln1_g": jnp.ones((1, E), jnp.float32),
        "ln1_b": jnp.zeros((1, E), jnp.float32),
        "wqkv": std * jax.random.normal(ks[0], (3 * E, E), jnp.float32),
        "bqkv": jnp.zeros((1, 3 * E), jnp.float32),
        "wo": std * jax.random.normal(ks[1], (E, E), jnp.float32),
        "bo": jnp.zeros((1, E), jnp.float32),
        "ln2_g": jnp.ones((1, E), jnp.float32),
        "ln2_b": jnp.zeros((1, E), jnp.float32),
        "w1": std * jax.random.normal(ks[2], (H, E), jnp.float32),
        "b1": jnp.zeros((1, H), jnp.float32),
        "w2": std * jax.random.normal(ks[3], (E, H), jnp.float32),
        "b2": jnp.zeros((1, E), jnp.float32),
    }


if __name__ == "__main__":
    # small shapes: seq=8, batch=2, embed=32, hidden=64, heads=4
    S, B, E, H, NH = 8, 2, 32, 64, 4
    key = jax.random.PRNGKey(0)
    kx, kp = jax.random.split(key)
    x = jax.random.normal(kx, (S, B, E), jnp.float32)
    params = init_params(kp, E, H)

    ref = attention_block_ref(x, params, NH)

    def run(compute_dtype):
        prep = prepare_params(params, NH, compute_dtype)
        try:
            out = attention_block(x, prep, NH, single_buffer_weights=True)
        except Exception:
            # pl.Buffered(1) not accepted by this JAX/Mosaic build -> default buffering.
            out = attention_block(x, prep, NH, single_buffer_weights=False)
        return jax.block_until_ready(out)

    # Production config: bf16 MXU operands, f32 accumulation / LN / softmax / residuals.
    out_bf16 = run(jnp.bfloat16)
    assert out_bf16.shape == (S, B, E)
    assert jnp.allclose(out_bf16, ref, atol=2e-2, rtol=2e-2), (
        float(jnp.max(jnp.abs(out_bf16 - ref))))

    # f32 path for a tight numerical check of the kernel wiring.
    out_f32 = run(jnp.float32)
    assert jnp.allclose(out_f32, ref, atol=2e-3, rtol=2e-3), (
        float(jnp.max(jnp.abs(out_f32 - ref))))

    print("KERNEL_OK")
</pallas_src>

<mosaic_0001>
module attributes {stable_mosaic.version = 11 : i64} {
  func.func @attention_block_kernel(%arg0: i32, %arg1: memref<1x8x32xf32, #tpu.memory_space<vmem>>, %arg2: memref<1x32xf32, #tpu.memory_space<vmem>>, %arg3: memref<1x32xf32, #tpu.memory_space<vmem>>, %arg4: memref<4x32x8xbf16, #tpu.memory_space<vmem>>, %arg5: memref<4x32x8xbf16, #tpu.memory_space<vmem>>, %arg6: memref<4x32x8xbf16, #tpu.memory_space<vmem>>, %arg7: memref<4x1x8xf32, #tpu.memory_space<vmem>>, %arg8: memref<4x1x8xf32, #tpu.memory_space<vmem>>, %arg9: memref<4x1x8xf32, #tpu.memory_space<vmem>>, %arg10: memref<4x8x32xbf16, #tpu.memory_space<vmem>>, %arg11: memref<1x32xf32, #tpu.memory_space<vmem>>, %arg12: memref<1x32xf32, #tpu.memory_space<vmem>>, %arg13: memref<1x32xf32, #tpu.memory_space<vmem>>, %arg14: memref<32x64xbf16, #tpu.memory_space<vmem>>, %arg15: memref<1x64xf32, #tpu.memory_space<vmem>>, %arg16: memref<64x32xbf16, #tpu.memory_space<vmem>>, %arg17: memref<1x32xf32, #tpu.memory_space<vmem>>, %arg18: memref<1x8x32xf32, #tpu.memory_space<vmem>>) attributes {dimension_semantics = [#tpu.dimension_semantics<parallel>], iteration_bounds = array<i64: 2>, scalar_prefetch = 0 : i64, scratch_operands = 0 : i64, tpu.core_type = #tpu.core_type<tc>, window_params = [{transform_indices = @transform_0, window_bounds = array<i64: 1, 8, 32>}, {pipeline_mode = #tpu.pipeline_mode<synchronous>, transform_indices = @transform_1, window_bounds = array<i64: 1, 32>}, {pipeline_mode = #tpu.pipeline_mode<synchronous>, transform_indices = @transform_2, window_bounds = array<i64: 1, 32>}, {pipeline_mode = #tpu.pipeline_mode<synchronous>, transform_indices = @transform_3, window_bounds = array<i64: 4, 32, 8>}, {pipeline_mode = #tpu.pipeline_mode<synchronous>, transform_indices = @transform_4, window_bounds = array<i64: 4, 32, 8>}, {pipeline_mode = #tpu.pipeline_mode<synchronous>, transform_indices = @transform_5, window_bounds = array<i64: 4, 32, 8>}, {pipeline_mode = #tpu.pipeline_mode<synchronous>, transform_indices = @transform_6, window_bounds = array<i64: 4, 1, 8>}, {pipeline_mode = #tpu.pipeline_mode<synchronous>, transform_indices = @transform_7, window_bounds = array<i64: 4, 1, 8>}, {pipeline_mode = #tpu.pipeline_mode<synchronous>, transform_indices = @transform_8, window_bounds = array<i64: 4, 1, 8>}, {pipeline_mode = #tpu.pipeline_mode<synchronous>, transform_indices = @transform_9, window_bounds = array<i64: 4, 8, 32>}, {pipeline_mode = #tpu.pipeline_mode<synchronous>, transform_indices = @transform_10, window_bounds = array<i64: 1, 32>}, {pipeline_mode = #tpu.pipeline_mode<synchronous>, transform_indices = @transform_11, window_bounds = array<i64: 1, 32>}, {pipeline_mode = #tpu.pipeline_mode<synchronous>, transform_indices = @transform_12, window_bounds = array<i64: 1, 32>}, {pipeline_mode = #tpu.pipeline_mode<synchronous>, transform_indices = @transform_13, window_bounds = array<i64: 32, 64>}, {pipeline_mode = #tpu.pipeline_mode<synchronous>, transform_indices = @transform_14, window_bounds = array<i64: 1, 64>}, {pipeline_mode = #tpu.pipeline_mode<synchronous>, transform_indices = @transform_15, window_bounds = array<i64: 64, 32>}, {pipeline_mode = #tpu.pipeline_mode<synchronous>, transform_indices = @transform_16, window_bounds = array<i64: 1, 32>}, {transform_indices = @transform_17, window_bounds = array<i64: 1, 8, 32>}]} {
    %c0 = arith.constant 0 : index
    %c0_0 = arith.constant 0 : index
    %c0_1 = arith.constant 0 : index
    %0 = vector.load %arg1[%c0, %c0_0, %c0_1] : memref<1x8x32xf32, #tpu.memory_space<vmem>>, vector<1x8x32xf32>
    %1 = vector.shape_cast %0 : vector<1x8x32xf32> to vector<8x32xf32>
    %c0_2 = arith.constant 0 : index
    %c0_3 = arith.constant 0 : index
    %2 = vector.load %arg2[%c0_2, %c0_3] : memref<1x32xf32, #tpu.memory_space<vmem>>, vector<1x32xf32>
    %c0_4 = arith.constant 0 : index
    %c0_5 = arith.constant 0 : index
    %3 = vector.load %arg3[%c0_4, %c0_5] : memref<1x32xf32, #tpu.memory_space<vmem>>, vector<1x32xf32>
    %cst = arith.constant dense<0.000000e+00> : vector<8xf32>
    %4 = vector.multi_reduction <add>, %1, %cst [1] : vector<8x32xf32> to vector<8xf32>
    %5 = vector.shape_cast %4 : vector<8xf32> to vector<8x1xf32>
    %cst_6 = arith.constant 3.200000e+01 : f32
    %6 = vector.broadcast %cst_6 : f32 to vector<8x1xf32>
    %7 = arith.divf %5, %6 : vector<8x1xf32>
    %8 = vector.broadcast %7 : vector<8x1xf32> to vector<8x32xf32>
    %9 = arith.subf %1, %8 : vector<8x32xf32>
    %10 = arith.mulf %9, %9 : vector<8x32xf32>
    %cst_7 = arith.constant dense<0.000000e+00> : vector<8xf32>
    %11 = vector.multi_reduction <add>, %10, %cst_7 [1] : vector<8x32xf32> to vector<8xf32>
    %12 = vector.shape_cast %11 : vector<8xf32> to vector<8x1xf32>
    %cst_8 = arith.constant 3.200000e+01 : f32
    %13 = vector.broadcast %cst_8 : f32 to vector<8x1xf32>
    %14 = arith.divf %12, %13 : vector<8x1xf32>
    %cst_9 = arith.constant 9.99999974E-6 : f32
    %15 = vector.broadcast %cst_9 : f32 to vector<8x1xf32>
    %16 = arith.addf %14, %15 : vector<8x1xf32>
    %17 = math.rsqrt %16 : vector<8x1xf32>
    %18 = vector.broadcast %17 : vector<8x1xf32> to vector<8x32xf32>
    %19 = arith.mulf %9, %18 : vector<8x32xf32>
    %20 = vector.broadcast %2 : vector<1x32xf32> to vector<8x32xf32>
    %21 = arith.mulf %19, %20 : vector<8x32xf32>
    %22 = vector.broadcast %3 : vector<1x32xf32> to vector<8x32xf32>
    %23 = arith.addf %21, %22 : vector<8x32xf32>
    %24 = arith.truncf %23 : vector<8x32xf32> to vector<8x32xbf16>
    %25 = vector.shape_cast %24 : vector<8x32xbf16> to vector<1x8x32xbf16>
    %26 = vector.shape_cast %25 : vector<1x8x32xbf16> to vector<1x8x32xbf16>
    %27 = vector.broadcast %26 : vector<1x8x32xbf16> to vector<4x8x32xbf16>
    %c0_10 = arith.constant 0 : index
    %c0_11 = arith.constant 0 : index
    %c0_12 = arith.constant 0 : index
    %28 = vector.load %arg4[%c0_10, %c0_11, %c0_12] : memref<4x32x8xbf16, #tpu.memory_space<vmem>>, vector<4x32x8xbf16>
    "tpu.trace_start"() <{level = 10 : i32, message = "hse,hed->hsd"}> : () -> ()
    %cst_13 = arith.constant dense<0.000000e+00> : vector<4x8x8xf32>
    %29 = tpu.matmul %27, %28, %cst_13 {dimension_numbers = #tpu.dot_dimension_numbers<[2], [1], [1], [2], [0, 0, 0, 1, 1, 2], [0], [0]>} : vector<4x8x32xbf16>, vector<4x32x8xbf16>, vector<4x8x8xf32> -> vector<4x8x8xf32>
    "tpu.trace_stop"() : () -> ()
    %c0_14 = arith.constant 0 : index
    %c0_15 = arith.constant 0 : index
    %c0_16 = arith.constant 0 : index
    %30 = vector.load %arg5[%c0_14, %c0_15, %c0_16] : memref<4x32x8xbf16, #tpu.memory_space<vmem>>, vector<4x32x8xbf16>
    "tpu.trace_start"() <{level = 10 : i32, message = "hse,hed->hsd"}> : () -> ()
    %cst_17 = arith.constant dense<0.000000e+00> : vector<4x8x8xf32>
    %31 = tpu.matmul %27, %30, %cst_17 {dimension_numbers = #tpu.dot_dimension_numbers<[2], [1], [1], [2], [0, 0, 0, 1, 1, 2], [0], [0]>} : vector<4x8x32xbf16>, vector<4x32x8xbf16>, vector<4x8x8xf32> -> vector<4x8x8xf32>
    "tpu.trace_stop"() : () -> ()
    %c0_18 = arith.constant 0 : index
    %c0_19 = arith.constant 0 : index
    %c0_20 = arith.constant 0 : index
    %32 = vector.load %arg6[%c0_18, %c0_19, %c0_20] : memref<4x32x8xbf16, #tpu.memory_space<vmem>>, vector<4x32x8xbf16>
    "tpu.trace_start"() <{level = 10 : i32, message = "hse,hed->hsd"}> : () -> ()
    %cst_21 = arith.constant dense<0.000000e+00> : vector<4x8x8xf32>
    %33 = tpu.matmul %27, %32, %cst_21 {dimension_numbers = #tpu.dot_dimension_numbers<[2], [1], [1], [2], [0, 0, 0, 1, 1, 2], [0], [0]>} : vector<4x8x32xbf16>, vector<4x32x8xbf16>, vector<4x8x8xf32> -> vector<4x8x8xf32>
    "tpu.trace_stop"() : () -> ()
    %c0_22 = arith.constant 0 : index
    %c0_23 = arith.constant 0 : index
    %c0_24 = arith.constant 0 : index
    %34 = vector.load %arg7[%c0_22, %c0_23, %c0_24] : memref<4x1x8xf32, #tpu.memory_space<vmem>>, vector<4x1x8xf32>
    %35 = vector.broadcast %34 : vector<4x1x8xf32> to vector<4x8x8xf32>
    %36 = arith.addf %29, %35 : vector<4x8x8xf32>
    %cst_25 = arith.constant 0.353553385 : f32
    %37 = vector.broadcast %cst_25 : f32 to vector<4x8x8xf32>
    %38 = arith.mulf %36, %37 : vector<4x8x8xf32>
    %c0_26 = arith.constant 0 : index
    %c0_27 = arith.constant 0 : index
    %c0_28 = arith.constant 0 : index
    %39 = vector.load %arg8[%c0_26, %c0_27, %c0_28] : memref<4x1x8xf32, #tpu.memory_space<vmem>>, vector<4x1x8xf32>
    %40 = vector.broadcast %39 : vector<4x1x8xf32> to vector<4x8x8xf32>
    %41 = arith.addf %31, %40 : vector<4x8x8xf32>
    %c0_29 = arith.constant 0 : index
    %c0_30 = arith.constant 0 : index
    %c0_31 = arith.constant 0 : index
    %42 = vector.load %arg9[%c0_29, %c0_30, %c0_31] : memref<4x1x8xf32, #tpu.memory_space<vmem>>, vector<4x1x8xf32>
    %43 = vector.broadcast %42 : vector<4x1x8xf32> to vector<4x8x8xf32>
    %44 = arith.addf %33, %43 : vector<4x8x8xf32>
    %45 = arith.truncf %38 : vector<4x8x8xf32> to vector<4x8x8xbf16>
    %46 = arith.truncf %41 : vector<4x8x8xf32> to vector<4x8x8xbf16>
    "tpu.trace_start"() <{level = 10 : i32, message = "hqd,hkd->hqk"}> : () -> ()
    %cst_32 = arith.constant dense<0.000000e+00> : vector<4x8x8xf32>
    %47 = tpu.matmul %45, %46, %cst_32 {dimension_numbers = #tpu.dot_dimension_numbers<[2], [2], [1], [1], [0, 0, 0, 1, 1, 1], [0], [0]>} : vector<4x8x8xbf16>, vector<4x8x8xbf16>, vector<4x8x8xf32> -> vector<4x8x8xf32>
    "tpu.trace_stop"() : () -> ()
    %cst_33 = arith.constant dense<0xFF800000> : vector<4x8xf32>
    %48 = vector.multi_reduction <maximumf>, %47, %cst_33 [2] : vector<4x8x8xf32> to vector<4x8xf32>
    %49 = vector.shape_cast %48 : vector<4x8xf32> to vector<4x8x1xf32>
    %50 = vector.broadcast %49 : vector<4x8x1xf32> to vector<4x8x8xf32>
    %51 = arith.subf %47, %50 : vector<4x8x8xf32>
    %52 = math.exp %51 : vector<4x8x8xf32>
    %cst_34 = arith.constant dense<0.000000e+00> : vector<4x8xf32>
    %53 = vector.multi_reduction <add>, %52, %cst_34 [2] : vector<4x8x8xf32> to vector<4x8xf32>
    %54 = vector.shape_cast %53 : vector<4x8xf32> to vector<4x8x1xf32>
    %55 = tpu.reciprocal %54 {approx = true} : vector<4x8x1xf32> -> vector<4x8x1xf32>
    %56 = vector.broadcast %55 : vector<4x8x1xf32> to vector<4x8x8xf32>
    %57 = arith.mulf %52, %56 : vector<4x8x8xf32>
    %58 = arith.truncf %57 : vector<4x8x8xf32> to vector<4x8x8xbf16>
    %59 = arith.truncf %44 : vector<4x8x8xf32> to vector<4x8x8xbf16>
    "tpu.trace_start"() <{level = 10 : i32, message = "hqk,hkd->hqd"}> : () -> ()
    %cst_35 = arith.constant dense<0.000000e+00> : vector<4x8x8xf32>
    %60 = tpu.matmul %58, %59, %cst_35 {dimension_numbers = #tpu.dot_dimension_numbers<[2], [1], [1], [2], [0, 0, 0, 1, 1, 2], [0], [0]>} : vector<4x8x8xbf16>, vector<4x8x8xbf16>, vector<4x8x8xf32> -> vector<4x8x8xf32>
    "tpu.trace_stop"() : () -> ()
    %61 = arith.truncf %60 : vector<4x8x8xf32> to vector<4x8x8xbf16>
    %c0_36 = arith.constant 0 : index
    %c0_37 = arith.constant 0 : index
    %c0_38 = arith.constant 0 : index
    %62 = vector.load %arg10[%c0_36, %c0_37, %c0_38] : memref<4x8x32xbf16, #tpu.memory_space<vmem>>, vector<4x8x32xbf16>
    "tpu.trace_start"() <{level = 10 : i32, message = "hsd,hde->hse"}> : () -> ()
    %cst_39 = arith.constant dense<0.000000e+00> : vector<4x8x32xf32>
    %63 = tpu.matmul %61, %62, %cst_39 {dimension_numbers = #tpu.dot_dimension_numbers<[2], [1], [1], [2], [0, 0, 0, 1, 1, 2], [0], [0]>} : vector<4x8x8xbf16>, vector<4x8x32xbf16>, vector<4x8x32xf32> -> vector<4x8x32xf32>
    "tpu.trace_stop"() : () -> ()
    %cst_40 = arith.constant dense<0.000000e+00> : vector<8x32xf32>
    %64 = vector.multi_reduction <add>, %63, %cst_40 [0] : vector<4x8x32xf32> to vector<8x32xf32>
    %c0_41 = arith.constant 0 : index
    %c0_42 = arith.constant 0 : index
    %65 = vector.load %arg11[%c0_41, %c0_42] : memref<1x32xf32, #tpu.memory_space<vmem>>, vector<1x32xf32>
    %66 = vector.broadcast %65 : vector<1x32xf32> to vector<8x32xf32>
    %67 = arith.addf %64, %66 : vector<8x32xf32>
    %68 = arith.addf %1, %67 : vector<8x32xf32>
    %c0_43 = arith.constant 0 : index
    %c0_44 = arith.constant 0 : index
    %69 = vector.load %arg12[%c0_43, %c0_44] : memref<1x32xf32, #tpu.memory_space<vmem>>, vector<1x32xf32>
    %c0_45 = arith.constant 0 : index
    %c0_46 = arith.constant 0 : index
    %70 = vector.load %arg13[%c0_45, %c0_46] : memref<1x32xf32, #tpu.memory_space<vmem>>, vector<1x32xf32>
    %cst_47 = arith.constant dense<0.000000e+00> : vector<8xf32>
    %71 = vector.multi_reduction <add>, %68, %cst_47 [1] : vector<8x32xf32> to vector<8xf32>
    %72 = vector.shape_cast %71 : vector<8xf32> to vector<8x1xf32>
    %cst_48 = arith.constant 3.200000e+01 : f32
    %73 = vector.broadcast %cst_48 : f32 to vector<8x1xf32>
    %74 = arith.divf %72, %73 : vector<8x1xf32>
    %75 = vector.broadcast %74 : vector<8x1xf32> to vector<8x32xf32>
    %76 = arith.subf %68, %75 : vector<8x32xf32>
    %77 = arith.mulf %76, %76 : vector<8x32xf32>
    %cst_49 = arith.constant dense<0.000000e+00> : vector<8xf32>
    %78 = vector.multi_reduction <add>, %77, %cst_49 [1] : vector<8x32xf32> to vector<8xf32>
    %79 = vector.shape_cast %78 : vector<8xf32> to vector<8x1xf32>
    %cst_50 = arith.constant 3.200000e+01 : f32
    %80 = vector.broadcast %cst_50 : f32 to vector<8x1xf32>
    %81 = arith.divf %79, %80 : vector<8x1xf32>
    %cst_51 = arith.constant 9.99999974E-6 : f32
    %82 = vector.broadcast %cst_51 : f32 to vector<8x1xf32>
    %83 = arith.addf %81, %82 : vector<8x1xf32>
    %84 = math.rsqrt %83 : vector<8x1xf32>
    %85 = vector.broadcast %84 : vector<8x1xf32> to vector<8x32xf32>
    %86 = arith.mulf %76, %85 : vector<8x32xf32>
    %87 = vector.broadcast %69 : vector<1x32xf32> to vector<8x32xf32>
    %88 = arith.mulf %86, %87 : vector<8x32xf32>
    %89 = vector.broadcast %70 : vector<1x32xf32> to vector<8x32xf32>
    %90 = arith.addf %88, %89 : vector<8x32xf32>
    %91 = arith.truncf %90 : vector<8x32xf32> to vector<8x32xbf16>
    %c0_52 = arith.constant 0 : index
    %c0_53 = arith.constant 0 : index
    %92 = vector.load %arg14[%c0_52, %c0_53] : memref<32x64xbf16, #tpu.memory_space<vmem>>, vector<32x64xbf16>
    %cst_54 = arith.constant dense<0.000000e+00> : vector<8x64xf32>
    %93 = tpu.matmul %91, %92, %cst_54 {dimension_numbers = #tpu.dot_dimension_numbers<[1], [0], [0], [1], [0, 0, 1, 1], [], []>} : vector<8x32xbf16>, vector<32x64xbf16>, vector<8x64xf32> -> vector<8x64xf32>
    %c0_55 = arith.constant 0 : index
    %c0_56 = arith.constant 0 : index
    %94 = vector.load %arg15[%c0_55, %c0_56] : memref<1x64xf32, #tpu.memory_space<vmem>>, vector<1x64xf32>
    %95 = vector.broadcast %94 : vector<1x64xf32> to vector<8x64xf32>
    %96 = arith.addf %93, %95 : vector<8x64xf32>
    %cst_57 = arith.constant 5.000000e-01 : f32
    %97 = vector.broadcast %cst_57 : f32 to vector<8x64xf32>
    %98 = arith.mulf %97, %96 : vector<8x64xf32>
    %cst_58 = arith.constant 0.707106769 : f32
    %99 = vector.broadcast %cst_58 : f32 to vector<8x64xf32>
    %100 = arith.mulf %96, %99 : vector<8x64xf32>
    %101 = math.erf %100 : vector<8x64xf32>
    %cst_59 = arith.constant 1.000000e+00 : f32
    %102 = vector.broadcast %cst_59 : f32 to vector<8x64xf32>
    %103 = arith.addf %102, %101 : vector<8x64xf32>
    %104 = arith.mulf %98, %103 : vector<8x64xf32>
    %105 = arith.truncf %104 : vector<8x64xf32> to vector<8x64xbf16>
    %c0_60 = arith.constant 0 : index
    %c0_61 = arith.constant 0 : index
    %106 = vector.load %arg16[%c0_60, %c0_61] : memref<64x32xbf16, #tpu.memory_space<vmem>>, vector<64x32xbf16>
    %cst_62 = arith.constant dense<0.000000e+00> : vector<8x32xf32>
    %107 = tpu.matmul %105, %106, %cst_62 {dimension_numbers = #tpu.dot_dimension_numbers<[1], [0], [0], [1], [0, 0, 1, 1], [], []>} : vector<8x64xbf16>, vector<64x32xbf16>, vector<8x32xf32> -> vector<8x32xf32>
    %c0_63 = arith.constant 0 : index
    %c0_64 = arith.constant 0 : index
    %108 = vector.load %arg17[%c0_63, %c0_64] : memref<1x32xf32, #tpu.memory_space<vmem>>, vector<1x32xf32>
    %109 = vector.broadcast %108 : vector<1x32xf32> to vector<8x32xf32>
    %110 = arith.addf %107, %109 : vector<8x32xf32>
    %111 = arith.addf %68, %110 : vector<8x32xf32>
    %c0_65 = arith.constant 0 : index
    %c0_66 = arith.constant 0 : index
    %c0_67 = arith.constant 0 : index
    %112 = vector.load %arg18[%c0_65, %c0_66, %c0_67] : memref<1x8x32xf32, #tpu.memory_space<vmem>>, vector<1x8x32xf32>
    %113 = vector.shape_cast %112 : vector<1x8x32xf32> to vector<8x32xf32>
    %114 = vector.shape_cast %111 : vector<8x32xf32> to vector<1x8x32xf32>
    tpu.vector_store %arg18[%c0_65, %c0_66, %c0_67], %114 {strides = array<i32>} : memref<1x8x32xf32, #tpu.memory_space<vmem>>, vector<1x8x32xf32>,
    return
  }
  func.func @transform_0(%arg0: i32) -> (i32, i32, i32) {
    %c0_i32 = arith.constant 0 : i32
    %c0_i32_0 = arith.constant 0 : i32
    %c0_i32_1 = arith.constant 0 : i32
    return %arg0, %c0_i32, %c0_i32_0 : i32, i32, i32
  }
  func.func @transform_1(%arg0: i32) -> (i32, i32) {
    %c0_i32 = arith.constant 0 : i32
    %c0_i32_0 = arith.constant 0 : i32
    %c0_i32_1 = arith.constant 0 : i32
    return %c0_i32, %c0_i32_0 : i32, i32
  }
  func.func @transform_2(%arg0: i32) -> (i32, i32) {
    %c0_i32 = arith.constant 0 : i32
    %c0_i32_0 = arith.constant 0 : i32
    %c0_i32_1 = arith.constant 0 : i32
    return %c0_i32, %c0_i32_0 : i32, i32
  }
  func.func @transform_3(%arg0: i32) -> (i32, i32, i32) {
    %c0_i32 = arith.constant 0 : i32
    %c0_i32_0 = arith.constant 0 : i32
    %c0_i32_1 = arith.constant 0 : i32
    %c0_i32_2 = arith.constant 0 : i32
    return %c0_i32, %c0_i32_0, %c0_i32_1 : i32, i32, i32
  }
  func.func @transform_4(%arg0: i32) -> (i32, i32, i32) {
    %c0_i32 = arith.constant 0 : i32
    %c0_i32_0 = arith.constant 0 : i32
    %c0_i32_1 = arith.constant 0 : i32
    %c0_i32_2 = arith.constant 0 : i32
    return %c0_i32, %c0_i32_0, %c0_i32_1 : i32, i32, i32
  }
  func.func @transform_5(%arg0: i32) -> (i32, i32, i32) {
    %c0_i32 = arith.constant 0 : i32
    %c0_i32_0 = arith.constant 0 : i32
    %c0_i32_1 = arith.constant 0 : i32
    %c0_i32_2 = arith.constant 0 : i32
    return %c0_i32, %c0_i32_0, %c0_i32_1 : i32, i32, i32
  }
  func.func @transform_6(%arg0: i32) -> (i32, i32, i32) {
    %c0_i32 = arith.constant 0 : i32
    %c0_i32_0 = arith.constant 0 : i32
    %c0_i32_1 = arith.constant 0 : i32
    %c0_i32_2 = arith.constant 0 : i32
    return %c0_i32, %c0_i32_0, %c0_i32_1 : i32, i32, i32
  }
  func.func @transform_7(%arg0: i32) -> (i32, i32, i32) {
    %c0_i32 = arith.constant 0 : i32
    %c0_i32_0 = arith.constant 0 : i32
    %c0_i32_1 = arith.constant 0 : i32
    %c0_i32_2 = arith.constant 0 : i32
    return %c0_i32, %c0_i32_0, %c0_i32_1 : i32, i32, i32
  }
  func.func @transform_8(%arg0: i32) -> (i32, i32, i32) {
    %c0_i32 = arith.constant 0 : i32
    %c0_i32_0 = arith.constant 0 : i32
    %c0_i32_1 = arith.constant 0 : i32
    %c0_i32_2 = arith.constant 0 : i32
    return %c0_i32, %c0_i32_0, %c0_i32_1 : i32, i32, i32
  }
  func.func @transform_9(%arg0: i32) -> (i32, i32, i32) {
    %c0_i32 = arith.constant 0 : i32
    %c0_i32_0 = arith.constant 0 : i32
    %c0_i32_1 = arith.constant 0 : i32
    %c0_i32_2 = arith.constant 0 : i32
    return %c0_i32, %c0_i32_0, %c0_i32_1 : i32, i32, i32
  }
  func.func @transform_10(%arg0: i32) -> (i32, i32) {
    %c0_i32 = arith.constant 0 : i32
    %c0_i32_0 = arith.constant 0 : i32
    %c0_i32_1 = arith.constant 0 : i32
    return %c0_i32, %c0_i32_0 : i32, i32
  }
  func.func @transform_11(%arg0: i32) -> (i32, i32) {
    %c0_i32 = arith.constant 0 : i32
    %c0_i32_0 = arith.constant 0 : i32
    %c0_i32_1 = arith.constant 0 : i32
    return %c0_i32, %c0_i32_0 : i32, i32
  }
  func.func @transform_12(%arg0: i32) -> (i32, i32) {
    %c0_i32 = arith.constant 0 : i32
    %c0_i32_0 = arith.constant 0 : i32
    %c0_i32_1 = arith.constant 0 : i32
    return %c0_i32, %c0_i32_0 : i32, i32
  }
  func.func @transform_13(%arg0: i32) -> (i32, i32) {
    %c0_i32 = arith.constant 0 : i32
    %c0_i32_0 = arith.constant 0 : i32
    %c0_i32_1 = arith.constant 0 : i32
    return %c0_i32, %c0_i32_0 : i32, i32
  }
  func.func @transform_14(%arg0: i32) -> (i32, i32) {
    %c0_i32 = arith.constant 0 : i32
    %c0_i32_0 = arith.constant 0 : i32
    %c0_i32_1 = arith.constant 0 : i32
    return %c0_i32, %c0_i32_0 : i32, i32
  }
  func.func @transform_15(%arg0: i32) -> (i32, i32) {
    %c0_i32 = arith.constant 0 : i32
    %c0_i32_0 = arith.constant 0 : i32
    %c0_i32_1 = arith.constant 0 : i32
    return %c0_i32, %c0_i32_0 : i32, i32
  }
  func.func @transform_16(%arg0: i32) -> (i32, i32) {
    %c0_i32 = arith.constant 0 : i32
    %c0_i32_0 = arith.constant 0 : i32
    %c0_i32_1 = arith.constant 0 : i32
    return %c0_i32, %c0_i32_0 : i32, i32
  }
  func.func @transform_17(%arg0: i32) -> (i32, i32, i32) {
    %c0_i32 = arith.constant 0 : i32
    %c0_i32_0 = arith.constant 0 : i32
    %c0_i32_1 = arith.constant 0 : i32
    return %arg0, %c0_i32, %c0_i32_0 : i32, i32, i32
  }
}

module attributes {stable_mosaic.version = 11 : i64} {
  func.func @attention_block_kernel(%arg0: i32, %arg1: memref<1x8x32xf32, #tpu.memory_space<vmem>>, %arg2: memref<1x32xf32, #tpu.memory_space<vmem>>, %arg3: memref<1x32xf32, #tpu.memory_space<vmem>>, %arg4: memref<4x32x8xbf16, #tpu.memory_space<vmem>>, %arg5: memref<4x32x8xbf16, #tpu.memory_space<vmem>>, %arg6: memref<4x32x8xbf16, #tpu.memory_space<vmem>>, %arg7: memref<4x1x8xf32, #tpu.memory_space<vmem>>, %arg8: memref<4x1x8xf32, #tpu.memory_space<vmem>>, %arg9: memref<4x1x8xf32, #tpu.memory_space<vmem>>, %arg10: memref<4x8x32xbf16, #tpu.memory_space<vmem>>, %arg11: memref<1x32xf32, #tpu.memory_space<vmem>>, %arg12: memref<1x32xf32, #tpu.memory_space<vmem>>, %arg13: memref<1x32xf32, #tpu.memory_space<vmem>>, %arg14: memref<32x64xbf16, #tpu.memory_space<vmem>>, %arg15: memref<1x64xf32, #tpu.memory_space<vmem>>, %arg16: memref<64x32xbf16, #tpu.memory_space<vmem>>, %arg17: memref<1x32xf32, #tpu.memory_space<vmem>>, %arg18: memref<1x8x32xf32, #tpu.memory_space<vmem>>) attributes {dimension_semantics = [#tpu.dimension_semantics<parallel>], iteration_bounds = array<i64: 2>, scalar_prefetch = 0 : i64, scratch_operands = 0 : i64, tpu.core_type = #tpu.core_type<tc>, window_params = [{transform_indices = @transform_0, window_bounds = array<i64: 1, 8, 32>}, {pipeline_mode = #tpu.pipeline_mode<synchronous>, transform_indices = @transform_1, window_bounds = array<i64: 1, 32>}, {pipeline_mode = #tpu.pipeline_mode<synchronous>, transform_indices = @transform_2, window_bounds = array<i64: 1, 32>}, {pipeline_mode = #tpu.pipeline_mode<synchronous>, transform_indices = @transform_3, window_bounds = array<i64: 4, 32, 8>}, {pipeline_mode = #tpu.pipeline_mode<synchronous>, transform_indices = @transform_4, window_bounds = array<i64: 4, 32, 8>}, {pipeline_mode = #tpu.pipeline_mode<synchronous>, transform_indices = @transform_5, window_bounds = array<i64: 4, 32, 8>}, {pipeline_mode = #tpu.pipeline_mode<synchronous>, transform_indices = @transform_6, window_bounds = array<i64: 4, 1, 8>}, {pipeline_mode = #tpu.pipeline_mode<synchronous>, transform_indices = @transform_7, window_bounds = array<i64: 4, 1, 8>}, {pipeline_mode = #tpu.pipeline_mode<synchronous>, transform_indices = @transform_8, window_bounds = array<i64: 4, 1, 8>}, {pipeline_mode = #tpu.pipeline_mode<synchronous>, transform_indices = @transform_9, window_bounds = array<i64: 4, 8, 32>}, {pipeline_mode = #tpu.pipeline_mode<synchronous>, transform_indices = @transform_10, window_bounds = array<i64: 1, 32>}, {pipeline_mode = #tpu.pipeline_mode<synchronous>, transform_indices = @transform_11, window_bounds = array<i64: 1, 32>}, {pipeline_mode = #tpu.pipeline_mode<synchronous>, transform_indices = @transform_12, window_bounds = array<i64: 1, 32>}, {pipeline_mode = #tpu.pipeline_mode<synchronous>, transform_indices = @transform_13, window_bounds = array<i64: 32, 64>}, {pipeline_mode = #tpu.pipeline_mode<synchronous>, transform_indices = @transform_14, window_bounds = array<i64: 1, 64>}, {pipeline_mode = #tpu.pipeline_mode<synchronous>, transform_indices = @transform_15, window_bounds = array<i64: 64, 32>}, {pipeline_mode = #tpu.pipeline_mode<synchronous>, transform_indices = @transform_16, window_bounds = array<i64: 1, 32>}, {transform_indices = @transform_17, window_bounds = array<i64: 1, 8, 32>}]} {
    %c0 = arith.constant 0 : index
    %c0_0 = arith.constant 0 : index
    %c0_1 = arith.constant 0 : index
    %0 = vector.load %arg1[%c0, %c0_0, %c0_1] : memref<1x8x32xf32, #tpu.memory_space<vmem>>, vector<1x8x32xf32>
    %1 = vector.shape_cast %0 : vector<1x8x32xf32> to vector<8x32xf32>
    %c0_2 = arith.constant 0 : index
    %c0_3 = arith.constant 0 : index
    %2 = vector.load %arg2[%c0_2, %c0_3] : memref<1x32xf32, #tpu.memory_space<vmem>>, vector<1x32xf32>
    %c0_4 = arith.constant 0 : index
    %c0_5 = arith.constant 0 : index
    %3 = vector.load %arg3[%c0_4, %c0_5] : memref<1x32xf32, #tpu.memory_space<vmem>>, vector<1x32xf32>
    %cst = arith.constant dense<0.000000e+00> : vector<8xf32>
    %4 = vector.multi_reduction <add>, %1, %cst [1] : vector<8x32xf32> to vector<8xf32>
    %5 = vector.shape_cast %4 : vector<8xf32> to vector<8x1xf32>
    %cst_6 = arith.constant 3.200000e+01 : f32
    %6 = vector.broadcast %cst_6 : f32 to vector<8x1xf32>
    %7 = arith.divf %5, %6 : vector<8x1xf32>
    %8 = vector.broadcast %7 : vector<8x1xf32> to vector<8x32xf32>
    %9 = arith.subf %1, %8 : vector<8x32xf32>
    %10 = arith.mulf %9, %9 : vector<8x32xf32>
    %cst_7 = arith.constant dense<0.000000e+00> : vector<8xf32>
    %11 = vector.multi_reduction <add>, %10, %cst_7 [1] : vector<8x32xf32> to vector<8xf32>
    %12 = vector.shape_cast %11 : vector<8xf32> to vector<8x1xf32>
    %cst_8 = arith.constant 3.200000e+01 : f32
    %13 = vector.broadcast %cst_8 : f32 to vector<8x1xf32>
    %14 = arith.divf %12, %13 : vector<8x1xf32>
    %cst_9 = arith.constant 9.99999974E-6 : f32
    %15 = vector.broadcast %cst_9 : f32 to vector<8x1xf32>
    %16 = arith.addf %14, %15 : vector<8x1xf32>
    %17 = math.rsqrt %16 : vector<8x1xf32>
    %18 = vector.broadcast %17 : vector<8x1xf32> to vector<8x32xf32>
    %19 = arith.mulf %9, %18 : vector<8x32xf32>
    %20 = vector.broadcast %2 : vector<1x32xf32> to vector<8x32xf32>
    %21 = arith.mulf %19, %20 : vector<8x32xf32>
    %22 = vector.broadcast %3 : vector<1x32xf32> to vector<8x32xf32>
    %23 = arith.addf %21, %22 : vector<8x32xf32>
    %24 = arith.truncf %23 : vector<8x32xf32> to vector<8x32xbf16>
    %25 = vector.shape_cast %24 : vector<8x32xbf16> to vector<1x8x32xbf16>
    %26 = vector.shape_cast %25 : vector<1x8x32xbf16> to vector<1x8x32xbf16>
    %27 = vector.broadcast %26 : vector<1x8x32xbf16> to vector<4x8x32xbf16>
    %c0_10 = arith.constant 0 : index
    %c0_11 = arith.constant 0 : index
    %c0_12 = arith.constant 0 : index
    %28 = vector.load %arg4[%c0_10, %c0_11, %c0_12] : memref<4x32x8xbf16, #tpu.memory_space<vmem>>, vector<4x32x8xbf16>
    "tpu.trace_start"() <{level = 10 : i32, message = "hse,hed->hsd"}> : () -> ()
    %cst_13 = arith.constant dense<0.000000e+00> : vector<4x8x8xf32>
    %29 = tpu.matmul %27, %28, %cst_13 {dimension_numbers = #tpu.dot_dimension_numbers<[2], [1], [1], [2], [0, 0, 0, 1, 1, 2], [0], [0]>} : vector<4x8x32xbf16>, vector<4x32x8xbf16>, vector<4x8x8xf32> -> vector<4x8x8xf32>
    "tpu.trace_stop"() : () -> ()
    %c0_14 = arith.constant 0 : index
    %c0_15 = arith.constant 0 : index
    %c0_16 = arith.constant 0 : index
    %30 = vector.load %arg5[%c0_14, %c0_15, %c0_16] : memref<4x32x8xbf16, #tpu.memory_space<vmem>>, vector<4x32x8xbf16>
    "tpu.trace_start"() <{level = 10 : i32, message = "hse,hed->hsd"}> : () -> ()
    %cst_17 = arith.constant dense<0.000000e+00> : vector<4x8x8xf32>
    %31 = tpu.matmul %27, %30, %cst_17 {dimension_numbers = #tpu.dot_dimension_numbers<[2], [1], [1], [2], [0, 0, 0, 1, 1, 2], [0], [0]>} : vector<4x8x32xbf16>, vector<4x32x8xbf16>, vector<4x8x8xf32> -> vector<4x8x8xf32>
    "tpu.trace_stop"() : () -> ()
    %c0_18 = arith.constant 0 : index
    %c0_19 = arith.constant 0 : index
    %c0_20 = arith.constant 0 : index
    %32 = vector.load %arg6[%c0_18, %c0_19, %c0_20] : memref<4x32x8xbf16, #tpu.memory_space<vmem>>, vector<4x32x8xbf16>
    "tpu.trace_start"() <{level = 10 : i32, message = "hse,hed->hsd"}> : () -> ()
    %cst_21 = arith.constant dense<0.000000e+00> : vector<4x8x8xf32>
    %33 = tpu.matmul %27, %32, %cst_21 {dimension_numbers = #tpu.dot_dimension_numbers<[2], [1], [1], [2], [0, 0, 0, 1, 1, 2], [0], [0]>} : vector<4x8x32xbf16>, vector<4x32x8xbf16>, vector<4x8x8xf32> -> vector<4x8x8xf32>
    "tpu.trace_stop"() : () -> ()
    %c0_22 = arith.constant 0 : index
    %c0_23 = arith.constant 0 : index
    %c0_24 = arith.constant 0 : index
    %34 = vector.load %arg7[%c0_22, %c0_23, %c0_24] : memref<4x1x8xf32, #tpu.memory_space<vmem>>, vector<4x1x8xf32>
    %35 = vector.broadcast %34 : vector<4x1x8xf32> to vector<4x8x8xf32>
    %36 = arith.addf %29, %35 : vector<4x8x8xf32>
    %cst_25 = arith.constant 0.353553385 : f32
    %37 = vector.broadcast %cst_25 : f32 to vector<4x8x8xf32>
    %38 = arith.mulf %36, %37 : vector<4x8x8xf32>
    %c0_26 = arith.constant 0 : index
    %c0_27 = arith.constant 0 : index
    %c0_28 = arith.constant 0 : index
    %39 = vector.load %arg8[%c0_26, %c0_27, %c0_28] : memref<4x1x8xf32, #tpu.memory_space<vmem>>, vector<4x1x8xf32>
    %40 = vector.broadcast %39 : vector<4x1x8xf32> to vector<4x8x8xf32>
    %41 = arith.addf %31, %40 : vector<4x8x8xf32>
    %c0_29 = arith.constant 0 : index
    %c0_30 = arith.constant 0 : index
    %c0_31 = arith.constant 0 : index
    %42 = vector.load %arg9[%c0_29, %c0_30, %c0_31] : memref<4x1x8xf32, #tpu.memory_space<vmem>>, vector<4x1x8xf32>
    %43 = vector.broadcast %42 : vector<4x1x8xf32> to vector<4x8x8xf32>
    %44 = arith.addf %33, %43 : vector<4x8x8xf32>
    %45 = arith.truncf %38 : vector<4x8x8xf32> to vector<4x8x8xbf16>
    %46 = arith.truncf %41 : vector<4x8x8xf32> to vector<4x8x8xbf16>
    "tpu.trace_start"() <{level = 10 : i32, message = "hqd,hkd->hqk"}> : () -> ()
    %cst_32 = arith.constant dense<0.000000e+00> : vector<4x8x8xf32>
    %47 = tpu.matmul %45, %46, %cst_32 {dimension_numbers = #tpu.dot_dimension_numbers<[2], [2], [1], [1], [0, 0, 0, 1, 1, 1], [0], [0]>} : vector<4x8x8xbf16>, vector<4x8x8xbf16>, vector<4x8x8xf32> -> vector<4x8x8xf32>
    "tpu.trace_stop"() : () -> ()
    %cst_33 = arith.constant dense<0xFF800000> : vector<4x8xf32>
    %48 = vector.multi_reduction <maximumf>, %47, %cst_33 [2] : vector<4x8x8xf32> to vector<4x8xf32>
    %49 = vector.shape_cast %48 : vector<4x8xf32> to vector<4x8x1xf32>
    %50 = vector.broadcast %49 : vector<4x8x1xf32> to vector<4x8x8xf32>
    %51 = arith.subf %47, %50 : vector<4x8x8xf32>
    %52 = math.exp %51 : vector<4x8x8xf32>
    %cst_34 = arith.constant dense<0.000000e+00> : vector<4x8xf32>
    %53 = vector.multi_reduction <add>, %52, %cst_34 [2] : vector<4x8x8xf32> to vector<4x8xf32>
    %54 = vector.shape_cast %53 : vector<4x8xf32> to vector<4x8x1xf32>
    %55 = tpu.reciprocal %54 {approx = true} : vector<4x8x1xf32> -> vector<4x8x1xf32>
    %56 = vector.broadcast %55 : vector<4x8x1xf32> to vector<4x8x8xf32>
    %57 = arith.mulf %52, %56 : vector<4x8x8xf32>
    %58 = arith.truncf %57 : vector<4x8x8xf32> to vector<4x8x8xbf16>
    %59 = arith.truncf %44 : vector<4x8x8xf32> to vector<4x8x8xbf16>
    "tpu.trace_start"() <{level = 10 : i32, message = "hqk,hkd->hqd"}> : () -> ()
    %cst_35 = arith.constant dense<0.000000e+00> : vector<4x8x8xf32>
    %60 = tpu.matmul %58, %59, %cst_35 {dimension_numbers = #tpu.dot_dimension_numbers<[2], [1], [1], [2], [0, 0, 0, 1, 1, 2], [0], [0]>} : vector<4x8x8xbf16>, vector<4x8x8xbf16>, vector<4x8x8xf32> -> vector<4x8x8xf32>
    "tpu.trace_stop"() : () -> ()
    %61 = arith.truncf %60 : vector<4x8x8xf32> to vector<4x8x8xbf16>
    %c0_36 = arith.constant 0 : index
    %c0_37 = arith.constant 0 : index
    %c0_38 = arith.constant 0 : index
    %62 = vector.load %arg10[%c0_36, %c0_37, %c0_38] : memref<4x8x32xbf16, #tpu.memory_space<vmem>>, vector<4x8x32xbf16>
    "tpu.trace_start"() <{level = 10 : i32, message = "hsd,hde->hse"}> : () -> ()
    %cst_39 = arith.constant dense<0.000000e+00> : vector<4x8x32xf32>
    %63 = tpu.matmul %61, %62, %cst_39 {dimension_numbers = #tpu.dot_dimension_numbers<[2], [1], [1], [2], [0, 0, 0, 1, 1, 2], [0], [0]>} : vector<4x8x8xbf16>, vector<4x8x32xbf16>, vector<4x8x32xf32> -> vector<4x8x32xf32>
    "tpu.trace_stop"() : () -> ()
    %cst_40 = arith.constant dense<0.000000e+00> : vector<8x32xf32>
    %64 = vector.multi_reduction <add>, %63, %cst_40 [0] : vector<4x8x32xf32> to vector<8x32xf32>
    %c0_41 = arith.constant 0 : index
    %c0_42 = arith.constant 0 : index
    %65 = vector.load %arg11[%c0_41, %c0_42] : memref<1x32xf32, #tpu.memory_space<vmem>>, vector<1x32xf32>
    %66 = vector.broadcast %65 : vector<1x32xf32> to vector<8x32xf32>
    %67 = arith.addf %64, %66 : vector<8x32xf32>
    %68 = arith.addf %1, %67 : vector<8x32xf32>
    %c0_43 = arith.constant 0 : index
    %c0_44 = arith.constant 0 : index
    %69 = vector.load %arg12[%c0_43, %c0_44] : memref<1x32xf32, #tpu.memory_space<vmem>>, vector<1x32xf32>
    %c0_45 = arith.constant 0 : index
    %c0_46 = arith.constant 0 : index
    %70 = vector.load %arg13[%c0_45, %c0_46] : memref<1x32xf32, #tpu.memory_space<vmem>>, vector<1x32xf32>
    %cst_47 = arith.constant dense<0.000000e+00> : vector<8xf32>
    %71 = vector.multi_reduction <add>, %68, %cst_47 [1] : vector<8x32xf32> to vector<8xf32>
    %72 = vector.shape_cast %71 : vector<8xf32> to vector<8x1xf32>
    %cst_48 = arith.constant 3.200000e+01 : f32
    %73 = vector.broadcast %cst_48 : f32 to vector<8x1xf32>
    %74 = arith.divf %72, %73 : vector<8x1xf32>
    %75 = vector.broadcast %74 : vector<8x1xf32> to vector<8x32xf32>
    %76 = arith.subf %68, %75 : vector<8x32xf32>
    %77 = arith.mulf %76, %76 : vector<8x32xf32>
    %cst_49 = arith.constant dense<0.000000e+00> : vector<8xf32>
    %78 = vector.multi_reduction <add>, %77, %cst_49 [1] : vector<8x32xf32> to vector<8xf32>
    %79 = vector.shape_cast %78 : vector<8xf32> to vector<8x1xf32>
    %cst_50 = arith.constant 3.200000e+01 : f32
    %80 = vector.broadcast %cst_50 : f32 to vector<8x1xf32>
    %81 = arith.divf %79, %80 : vector<8x1xf32>
    %cst_51 = arith.constant 9.99999974E-6 : f32
    %82 = vector.broadcast %cst_51 : f32 to vector<8x1xf32>
    %83 = arith.addf %81, %82 : vector<8x1xf32>
    %84 = math.rsqrt %83 : vector<8x1xf32>
    %85 = vector.broadcast %84 : vector<8x1xf32> to vector<8x32xf32>
    %86 = arith.mulf %76, %85 : vector<8x32xf32>
    %87 = vector.broadcast %69 : vector<1x32xf32> to vector<8x32xf32>
    %88 = arith.mulf %86, %87 : vector<8x32xf32>
    %89 = vector.broadcast %70 : vector<1x32xf32> to vector<8x32xf32>
    %90 = arith.addf %88, %89 : vector<8x32xf32>
    %91 = arith.truncf %90 : vector<8x32xf32> to vector<8x32xbf16>
    %c0_52 = arith.constant 0 : index
    %c0_53 = arith.constant 0 : index
    %92 = vector.load %arg14[%c0_52, %c0_53] : memref<32x64xbf16, #tpu.memory_space<vmem>>, vector<32x64xbf16>
    %cst_54 = arith.constant dense<0.000000e+00> : vector<8x64xf32>
    %93 = tpu.matmul %91, %92, %cst_54 {dimension_numbers = #tpu.dot_dimension_numbers<[1], [0], [0], [1], [0, 0, 1, 1], [], []>} : vector<8x32xbf16>, vector<32x64xbf16>, vector<8x64xf32> -> vector<8x64xf32>
    %c0_55 = arith.constant 0 : index
    %c0_56 = arith.constant 0 : index
    %94 = vector.load %arg15[%c0_55, %c0_56] : memref<1x64xf32, #tpu.memory_space<vmem>>, vector<1x64xf32>
    %95 = vector.broadcast %94 : vector<1x64xf32> to vector<8x64xf32>
    %96 = arith.addf %93, %95 : vector<8x64xf32>
    %cst_57 = arith.constant 5.000000e-01 : f32
    %97 = vector.broadcast %cst_57 : f32 to vector<8x64xf32>
    %98 = arith.mulf %97, %96 : vector<8x64xf32>
    %cst_58 = arith.constant 0.707106769 : f32
    %99 = vector.broadcast %cst_58 : f32 to vector<8x64xf32>
    %100 = arith.mulf %96, %99 : vector<8x64xf32>
    %101 = math.erf %100 : vector<8x64xf32>
    %cst_59 = arith.constant 1.000000e+00 : f32
    %102 = vector.broadcast %cst_59 : f32 to vector<8x64xf32>
    %103 = arith.addf %102, %101 : vector<8x64xf32>
    %104 = arith.mulf %98, %103 : vector<8x64xf32>
    %105 = arith.truncf %104 : vector<8x64xf32> to vector<8x64xbf16>
    %c0_60 = arith.constant 0 : index
    %c0_61 = arith.constant 0 : index
    %106 = vector.load %arg16[%c0_60, %c0_61] : memref<64x32xbf16, #tpu.memory_space<vmem>>, vector<64x32xbf16>
    %cst_62 = arith.constant dense<0.000000e+00> : vector<8x32xf32>
    %107 = tpu.matmul %105, %106, %cst_62 {dimension_numbers = #tpu.dot_dimension_numbers<[1], [0], [0], [1], [0, 0, 1, 1], [], []>} : vector<8x64xbf16>, vector<64x32xbf16>, vector<8x32xf32> -> vector<8x32xf32>
    %c0_63 = arith.constant 0 : index
    %c0_64 = arith.constant 0 : index
    %108 = vector.load %arg17[%c0_63, %c0_64] : memref<1x32xf32, #tpu.memory_space<vmem>>, vector<1x32xf32>
    %109 = vector.broadcast %108 : vector<1x32xf32> to vector<8x32xf32>
    %110 = arith.addf %107, %109 : vector<8x32xf32>
    %111 = arith.addf %68, %110 : vector<8x32xf32>
    %c0_65 = arith.constant 0 : index
    %c0_66 = arith.constant 0 : index
    %c0_67 = arith.constant 0 : index
    %112 = vector.load %arg18[%c0_65, %c0_66, %c0_67] : memref<1x8x32xf32, #tpu.memory_space<vmem>>, vector<1x8x32xf32>
    %113 = vector.shape_cast %112 : vector<1x8x32xf32> to vector<8x32xf32>
    %114 = vector.shape_cast %111 : vector<8x32xf32> to vector<1x8x32xf32>
    tpu.vector_store %arg18[%c0_65, %c0_66, %c0_67], %114 {strides = array<i32>} : memref<1x8x32xf32, #tpu.memory_space<vmem>>, vector<1x8x32xf32>,
    return
  }
  func.func @transform_0(%arg0: i32) -> (i32, i32, i32) {
    %c0_i32 = arith.constant 0 : i32
    %c0_i32_0 = arith.constant 0 : i32
    %c0_i32_1 = arith.constant 0 : i32
    return %arg0, %c0_i32, %c0_i32_0 : i32, i32, i32
  }
  func.func @transform_1(%arg0: i32) -> (i32, i32) {
    %c0_i32 = arith.constant 0 : i32
    %c0_i32_0 = arith.constant 0 : i32
    %c0_i32_1 = arith.constant 0 : i32
    return %c0_i32, %c0_i32_0 : i32, i32
  }
  func.func @transform_2(%arg0: i32) -> (i32, i32) {
    %c0_i32 = arith.constant 0 : i32
    %c0_i32_0 = arith.constant 0 : i32
    %c0_i32_1 = arith.constant 0 : i32
    return %c0_i32, %c0_i32_0 : i32, i32
  }
  func.func @transform_3(%arg0: i32) -> (i32, i32, i32) {
    %c0_i32 = arith.constant 0 : i32
    %c0_i32_0 = arith.constant 0 : i32
    %c0_i32_1 = arith.constant 0 : i32
    %c0_i32_2 = arith.constant 0 : i32
    return %c0_i32, %c0_i32_0, %c0_i32_1 : i32, i32, i32
  }
  func.func @transform_4(%arg0: i32) -> (i32, i32, i32) {
    %c0_i32 = arith.constant 0 : i32
    %c0_i32_0 = arith.constant 0 : i32
    %c0_i32_1 = arith.constant 0 : i32
    %c0_i32_2 = arith.constant 0 : i32
    return %c0_i32, %c0_i32_0, %c0_i32_1 : i32, i32, i32
  }
  func.func @transform_5(%arg0: i32) -> (i32, i32, i32) {
    %c0_i32 = arith.constant 0 : i32
    %c0_i32_0 = arith.constant 0 : i32
    %c0_i32_1 = arith.constant 0 : i32
    %c0_i32_2 = arith.constant 0 : i32
    return %c0_i32, %c0_i32_0, %c0_i32_1 : i32, i32, i32
  }
  func.func @transform_6(%arg0: i32) -> (i32, i32, i32) {
    %c0_i32 = arith.constant 0 : i32
    %c0_i32_0 = arith.constant 0 : i32
    %c0_i32_1 = arith.constant 0 : i32
    %c0_i32_2 = arith.constant 0 : i32
    return %c0_i32, %c0_i32_0, %c0_i32_1 : i32, i32, i32
  }
  func.func @transform_7(%arg0: i32) -> (i32, i32, i32) {
    %c0_i32 = arith.constant 0 : i32
    %c0_i32_0 = arith.constant 0 : i32
    %c0_i32_1 = arith.constant 0 : i32
    %c0_i32_2 = arith.constant 0 : i32
    return %c0_i32, %c0_i32_0, %c0_i32_1 : i32, i32, i32
  }
  func.func @transform_8(%arg0: i32) -> (i32, i32, i32) {
    %c0_i32 = arith.constant 0 : i32
    %c0_i32_0 = arith.constant 0 : i32
    %c0_i32_1 = arith.constant 0 : i32
    %c0_i32_2 = arith.constant 0 : i32
    return %c0_i32, %c0_i32_0, %c0_i32_1 : i32, i32, i32
  }
  func.func @transform_9(%arg0: i32) -> (i32, i32, i32) {
    %c0_i32 = arith.constant 0 : i32
    %c0_i32_0 = arith.constant 0 : i32
    %c0_i32_1 = arith.constant 0 : i32
    %c0_i32_2 = arith.constant 0 : i32
    return %c0_i32, %c0_i32_0, %c0_i32_1 : i32, i32, i32
  }
  func.func @transform_10(%arg0: i32) -> (i32, i32) {
    %c0_i32 = arith.constant 0 : i32
    %c0_i32_0 = arith.constant 0 : i32
    %c0_i32_1 = arith.constant 0 : i32
    return %c0_i32, %c0_i32_0 : i32, i32
  }
  func.func @transform_11(%arg0: i32) -> (i32, i32) {
    %c0_i32 = arith.constant 0 : i32
    %c0_i32_0 = arith.constant 0 : i32
    %c0_i32_1 = arith.constant 0 : i32
    return %c0_i32, %c0_i32_0 : i32, i32
  }
  func.func @transform_12(%arg0: i32) -> (i32, i32) {
    %c0_i32 = arith.constant 0 : i32
    %c0_i32_0 = arith.constant 0 : i32
    %c0_i32_1 = arith.constant 0 : i32
    return %c0_i32, %c0_i32_0 : i32, i32
  }
  func.func @transform_13(%arg0: i32) -> (i32, i32) {
    %c0_i32 = arith.constant 0 : i32
    %c0_i32_0 = arith.constant 0 : i32
    %c0_i32_1 = arith.constant 0 : i32
    return %c0_i32, %c0_i32_0 : i32, i32
  }
  func.func @transform_14(%arg0: i32) -> (i32, i32) {
    %c0_i32 = arith.constant 0 : i32
    %c0_i32_0 = arith.constant 0 : i32
    %c0_i32_1 = arith.constant 0 : i32
    return %c0_i32, %c0_i32_0 : i32, i32
  }
  func.func @transform_15(%arg0: i32) -> (i32, i32) {
    %c0_i32 = arith.constant 0 : i32
    %c0_i32_0 = arith.constant 0 : i32
    %c0_i32_1 = arith.constant 0 : i32
    return %c0_i32, %c0_i32_0 : i32, i32
  }
  func.func @transform_16(%arg0: i32) -> (i32, i32) {
    %c0_i32 = arith.constant 0 : i32
    %c0_i32_0 = arith.constant 0 : i32
    %c0_i32_1 = arith.constant 0 : i32
    return %c0_i32, %c0_i32_0 : i32, i32
  }
  func.func @transform_17(%arg0: i32) -> (i32, i32, i32) {
    %c0_i32 = arith.constant 0 : i32
    %c0_i32_0 = arith.constant 0 : i32
    %c0_i32_1 = arith.constant 0 : i32
    return %arg0, %c0_i32, %c0_i32_0 : i32, i32, i32
  }
}

</mosaic_0001>

<bundles_post_ra>
// kernel: tpu_custom_call.1
= control target key start
LH: loop header
LB: loop body
LE: loop exit
PB: predicated region body
PF: predicated region fallthrough
CT: control target
= control target key end

     0   :  { %s3259_s0 = inlined_call_operand.vmem [shape: f32[2,8,32], index: 0, kind: input, shape index: {}]   ;;  %s3260_s1 = inlined_call_operand.vmem [shape: f32[1,32], index: 1, kind: input, shape index: {}]   ;;  %s3261_s2 = inlined_call_operand.vmem [shape: f32[1,32], index: 2, kind: input, shape index: {}]   ;;  %s3262_s3 = inlined_call_operand.vmem [shape: bf16[4,32,8], index: 3, kind: input, shape index: {}]   ;;  %s3263_s4 = inlined_call_operand.vmem [shape: bf16[4,32,8], index: 4, kind: input, shape index: {}]   ;;  %s3264_s5 = inlined_call_operand.vmem [shape: bf16[4,32,8], index: 5, kind: input, shape index: {}]   ;;  %s3265_s6 = inlined_call_operand.vmem [shape: f32[4,1,8], index: 6, kind: input, shape index: {}]   ;;  %s3266_s7 = inlined_call_operand.vmem [shape: f32[4,1,8], index: 7, kind: input, shape index: {}]   ;;  %s3267_s8 = inlined_call_operand.vmem [shape: f32[4,1,8], index: 8, kind: input, shape index: {}]   ;;  %s3268_s9 = inlined_call_operand.vmem [shape: bf16[4,8,32], index: 9, kind: input, shape index: {}]   ;;  %s3269_s10 = inlined_call_operand.vmem [shape: f32[1,32], index: 10, kind: input, shape index: {}]   ;;  %s3270_s11 = inlined_call_operand.vmem [shape: f32[1,32], index: 11, kind: input, shape index: {}]   ;;  %s3271_s12 = inlined_call_operand.vmem [shape: f32[1,32], index: 12, kind: input, shape index: {}]   ;;  %s3272_s13 = inlined_call_operand.vmem [shape: bf16[32,64], index: 13, kind: input, shape index: {}]   ;;  %s3273_s14 = inlined_call_operand.vmem [shape: f32[1,64], index: 14, kind: input, shape index: {}]   ;;  %s3274_s15 = inlined_call_operand.vmem [shape: bf16[64,32], index: 15, kind: input, shape index: {}]   ;;  %s3275_s16 = inlined_call_operand.vmem [shape: f32[1,32], index: 16, kind: input, shape index: {}]   ;;  %s3276_s17 = inlined_call_operand.hbm [shape: f32[2,8,32], index: 17, kind: output, shape index: {}]  }
   0x1   :  { %3280 = sst [smem:[#allocation8_spill]] %s3259_s0 }
   0x2   :  { %3281 = sst [smem:[#allocation9_spill]] %s3260_s1 }
   0x3   :  { %3282 = sst [smem:[#allocation10_spill]] %s3261_s2 }
   0x4   :  { %3283 = sst [smem:[#allocation11_spill]] %s3262_s3 }
   0x5   :  { %22 = vsyncpa [#allocation3], 0 }
   0x6   :  { %24 = vsyncpa [#allocation3 + $0x1], 0  ;;  %s2828_s24 = smov 0   ;;  %s2830_s25 = smov 0  }
   0x7   :  { %s2832_s26 = smov 0   ;;  %s2834_s27 = smov 0  }
   0x8 LB: > { %3284 = sst [smem:[#allocation5_spill]] %s2729_s26  ;;  %s2849_s28 = sadd.s32 4294967295, %s2733_s27   ;;  %s2733_s27 = sphi %s2834_s27, %s3293_s27   ;;  %s2729_s26 = sphi %s2832_s26, %s3295_s26   ;;  %s2725_s25 = sphi %s2830_s25, %s3297_s25   ;;  %s2721_s24 = sphi %s2828_s24, %s3296_s24  }
   0x9   : > { %s2239_s29 = sadd.s32 4294967294, %s2733_s27   ;;  %s2853_s0 = sadd.s32 1, %s2733_s27  }
   0xa   : > { %3285 = sst [smem:[#allocation6_spill]] %s2853_s0  ;;  %s399_s30 = sadd.s32 1, %s2729_s26 }
   0xb   : > { %s396_s18 = ssub.s32 %s2733_s27, %s2853_s0  ;;  %p409_p0 = scmp.ne.s32.totalorder %s2729_s26, %s2725_s25 }
   0xc   : > { %p397_p1 = scmp.eq.s32.totalorder %s396_s18, 0  ;;  %p410_p2 = scmp.eq.s32.totalorder %s2849_s28, 1 }
   0xd   : > { %p415_p3 = scmp.ne.s32.totalorder %s2725_s25, %s2721_s24  ;;  %p416_p4 = scmp.eq.s32.totalorder %s2239_s29, 1 }
   0xe   : > { %s2864_s19 = scalar_select %p397_p1, %s2729_s26, %s399_s30  }
   0xf   : > { %p2866_p5 = por %p410_p2, %p409_p0  ;;  %p2870_p6 = por %p416_p4, %p415_p3 }
  0x10   : > { %3286 = sst [smem:[#allocation7_spill]] %s2864_s19  ;;  %p2242_p7 = scmp.ge.s32.totalorder %s2733_s27, 1 }
  0x11   : > { %p489_p8 = scmp.lt.s32.totalorder %s2733_s27, 3 }
  0x13   : > { %p490_p9 = pnand %p2242_p7, %p489_p8 }
  0x14   : > { %p540_p10 = scmp.lt.s32.totalorder (!%p490_p9), %s2849_s28, 1  ;;  %s3289_s30 = sld [smem:[#allocation8_spill]] (!%p490_p9) }
  0x15   : > { %493 = sbr.rel (%p490_p9) target bundleno = 2214 (0x8a6), region = 88  ;;  %s3290_s3 = sld [smem:[#allocation11_spill]] (!%p490_p9) }
  0x16   : > { %s3292_s2 = sld [smem:[#allocation10_spill]] (!%p490_p9)  ;;  %s537_s19 = sand.u32 (!%p490_p9), 1, %s2725_s25  }
  0x1a   : > { %s541_s21 = scalar_select %p540_p10, %s2849_s28, 1  ;;  %vm548_vm0 = vcmask 261120   ;;  %v2735_v9 = vmov 0.0   ;;  %vm2736_vm1 = vmmov 0   ;;  %v2629_v26 = vld [vmem:[%s3263_s4 + $0x8] sm:$0xff]   ;;  %v2630_v27 = vld [vmem:[%s3263_s4 + $0x18] sm:$0xff]  }
  0x1b   : > { %v2621_v7 = vld [vmem:[%s3290_s3 + $0x8] sm:$0xff]   ;;  %v2622_v8 = vld [vmem:[%s3290_s3 + $0x18] sm:$0xff]   ;;  %2392 = vmatprep.subr.bf16.mxu0 %v2735_v9  ;;  %2400 = vmatprep.subr.bf16.mxu1 %v2735_v9  ;;  %v2623_v10 = vld [vmem:[%s3290_s3] sm:$0xff]   ;;  %vm1349_vm2 = vcmask 64512   ;;  %vm1589_vm3 = vcmask 1043456   ;;  %vm2120_vm4 = vcmask 523264  }
  0x1c   : > { %s2244_s22 = sshll.u32 %s541_s21, 3  ;;  %2393 = vmatpush3.bf16.msra.mxu0 %v2621_v7  ;;  %2401 = vmatpush3.bf16.msra.mxu1 %v2622_v8  ;;  %v2624_v11 = vld [vmem:[%s3290_s3 + $0x10] sm:$0xff]   ;;  %v2246_v18 = vld [vmem:[%s3292_s2] ss:$0 sm:$0xff]  ;;  %v2625_v21 = vld [vmem:[%s3290_s3 + $0x28] sm:$0xff]   ;;  %s2737_s21 = smov [#allocation2]  }
  0x1d   : > { %s543_s18 = scalar_lea.vmem %s3289_s30, %s2244_s22  ;;  %2394 = vmatprep.subr.bf16.mxu0 %v2735_v9  ;;  %2402 = vmatprep.subr.bf16.mxu1 %v2735_v9  ;;  %s3291_s22 = sld [smem:[#allocation9_spill]]  ;;  %v2626_v22 = vld [vmem:[%s3290_s3 + $0x38] sm:$0xff]   ;;  %v2627_v24 = vld [vmem:[%s3290_s3 + $0x20] sm:$0xff]   ;;  %v2628_v25 = vld [vmem:[%s3290_s3 + $0x30] sm:$0xff]  }
  0x1e   : > { %v2881_v0 = vld [vmem:[%s543_s18] sm:$0xff]  ;;  %2396 = vmatprep.mubr.msk.bf16.mxu0 %vm2736_vm1, %v2735_v9  ;;  %2404 = vmatprep.mubr.msk.bf16.mxu1 %vm2736_vm1, %v2735_v9  ;;  %v2632_v29 = vld [vmem:[%s3263_s4 + $0x10] sm:$0xff]   ;;  %v2633_v30 = vld [vmem:[%s3263_s4 + $0x28] sm:$0xff]   ;;  %s2243_s18 = sshll.u32 %s537_s19, 3  ;;  %s2677_s23 = sshll.u32 %s2737_s21, 4  ;;  %s2678_s23 = int_to_ptr.vmem [resolvable:$false] %s2677_s23 }
  0x1f   : > { %v549_v1 = vsel %vm548_vm0, %v2881_v0, 0.0  ;;  %v2631_v28 = vld [vmem:[%s3263_s4] sm:$0xff]   ;;  %v2634_v31 = vld [vmem:[%s3263_s4 + $0x38] sm:$0xff]   ;;  %v2636_v33 = vld [vmem:[%s3263_s4 + $0x30] sm:$0xff]   ;;  %s539_s29 = scalar_lea.vmem [#allocation2], %s2243_s18 }
  0x20   : > { %550 = vadd.xlane.f32.xlu0 %v549_v1  ;;  %2395 = vmatpush3.bf16.msra.mxu0 %v2623_v10  ;;  %v2635_v32 = vld [vmem:[%s3263_s4 + $0x20] sm:$0xff]   ;;  %v2637_v34 = vld [vmem:[%s3264_s5 + $0x8] sm:$0xff]   ;;  %v2638_v35 = vld [vmem:[%s3264_s5 + $0x18] sm:$0xff]   ;;  %s2180_s26 = sshll.u32 %s539_s29, 4  ;;  %s3219_s26 = int_to_ptr.vmem [resolvable:$true] %s2180_s26 }
  0x21   : > { %2403 = vmatpush3.bf16.msra.mxu1 %v2624_v11  ;;  %2408 = vmatprep.subr.bf16.mxu0 %v2735_v9  ;;  %v2639_v36 = vld [vmem:[%s3264_s5] sm:$0xff]   ;;  %v2640_v37 = vld [vmem:[%s3264_s5 + $0x10] sm:$0xff]   ;;  %v2641_v38 = vld [vmem:[%s3264_s5 + $0x28] sm:$0xff]   ;;  %s2673_s18 = scalar_lea.vmem %s3219_s26, 128  ;;  %p2680_p0 = scmp.lt.s32.totalorder %s3219_s26, %s2678_s23 }
  0x22   : > { %2416 = vmatprep.subr.bf16.mxu1 %v2735_v9  ;;  %v2642_v39 = vld [vmem:[%s3264_s5 + $0x38] sm:$0xff]   ;;  %v2643_v40 = vld [vmem:[%s3264_s5 + $0x20] sm:$0xff]   ;;  %v2644_v41 = vld [vmem:[%s3264_s5 + $0x30] sm:$0xff]   ;;  %p2674_p11 = scmp.ne.s32.totalorder %s3219_s26, %s2673_s18 }
  0x23   : > { %v2245_v16 = vld [vmem:[%s3291_s22] ss:$0 sm:$0xff]  ;;  %v2264_v59 = vld [vmem:[%s3266_s7 + $0x1] ss:$0 sm:$0xff]  ;;  %s2321_s22 = sshll.u32 %s2849_s28, 7  ;;  %s2167_s28 = scalar_lea.sflag [#allocation3], %s537_s19 }
  0x24   : > { %v2263_v58 = vld [vmem:[%s3266_s7] ss:$0 sm:$0xff]  ;;  %v2248_v61 = vld [vmem:[%s3265_s6 + $0x1] ss:$0 sm:$0xff]  ;;  %s3217_s2 = scalar_lea.hbm %s3276_s17, %s2321_s22  ;;  %p2675_p12 = pnand %p2674_p11, %p2866_p5 }
  0x25   : > { %v2247_v60 = vld [vmem:[%s3265_s6] ss:$0 sm:$0xff]  ;;  %s2679_s22 = scalar_lea.vmem %s2678_s23, 256 }
  0x26   : > { %p2676_p13 = pneg %p2675_p12  ;;  %p2681_p1 = scmp.lt.s32.totalorder %s2679_s22, %s2673_s18 }
  0x28   : > { %p2682_p2 = por %p2681_p1, %p2680_p0 }
  0x2a   : > { %p2683_p3 = pnand %p2682_p2, %p2676_p13 }
  0xa9   : > { %v551_v2 = vpop.xlane.xlu0 %550 }
  0xaa   : > { %v553_v3 = vmul.f32 0.03125, %v551_v2 }
  0xac   : > { %v554_v4 = vsub.f32 %v2881_v0, %v553_v3 }
  0xae   : > { %v555_v5 = vmul.f32 %v554_v4, %v554_v4 }
  0xb0   : > { %v556_v6 = vsel %vm548_vm0, %v555_v5, 0.0 }
  0xb1   : > { %557 = vadd.xlane.f32.xlu0 %v556_v6 }
 0x13a   : > { %v558_v12 = vpop.xlane.xlu0 %557 }
 0x13b   : > { %v559_v13 = vmul.f32 0.03125, %v558_v12 }
 0x13d   : > { %v560_v14 = vadd.f32 1e-05, %v559_v13 }
 0x13f   : > { %2651 = vrsqrt.f32 %v560_v14  ;;  %v2265_v14 = vld [vmem:[%s3266_s7 + $0x2] ss:$0 sm:$0xff] }
 0x14c   : > { %v2652_v15 = vpop.eup %2651 }
 0x14d   : > { %v562_v17 = vmul.f32 %v2652_v15, %v554_v4 }
 0x14f   : > { %v569_v19 = vmul.f32 %v2245_v16, %v562_v17 }
 0x151   : > { %v576_v20 = vadd.f32 %v2246_v18, %v569_v19  ;;  %v2266_v19 = vld [vmem:[%s3266_s7 + $0x3] ss:$0 sm:$0xff] }
 0x153   : > { %v2921_v23 = vpack.c.bf16 %v576_v20, %v576_v20  ;;  %v2249_v20 = vld [vmem:[%s3265_s6 + $0x2] ss:$0 sm:$0xff] }
 0x155   : > { %2397 = vmatmul.mubr.msk.bf16.vlgmr.msra.gmra.mxu0 %vm548_vm0, %v2921_v23  ;;  %2405 = vmatmul.mubr.msk.bf16.vlgmr.msra.gmra.mxu1 %vm548_vm0, %v2921_v23 }
 0x156   : > { %2409 = vmatpush3.bf16.msra.mxu0 %v2625_v21  ;;  %2417 = vmatpush3.bf16.msra.mxu1 %v2626_v22  ;;  %v2250_v21 = vld [vmem:[%s3265_s6 + $0x3] ss:$0 sm:$0xff] }
 0x157   : > { %2410 = vmatprep.subr.bf16.mxu0 %v2735_v9  ;;  %2418 = vmatprep.subr.bf16.mxu1 %v2735_v9 }
 0x158   : > { %2412 = vmatprep.mubr.msk.bf16.mxu0 %vm2736_vm1, %v2735_v9  ;;  %2420 = vmatprep.mubr.msk.bf16.mxu1 %vm2736_vm1, %v2735_v9 }
 0x15a   : > { %2411 = vmatpush3.bf16.msra.mxu0 %v2627_v24  ;;  %2419 = vmatpush3.bf16.msra.mxu1 %v2628_v25 }
 0x15b   : > { %2424 = vmatprep.subr.bf16.mxu0 %v2735_v9  ;;  %2432 = vmatprep.subr.bf16.mxu1 %v2735_v9 }
 0x15d   : > { %2413 = vmatmul.mubr.msk.bf16.vlgmr.msra.gmra.mxu0 %vm548_vm0, %v2921_v23  ;;  %2421 = vmatmul.mubr.msk.bf16.vlgmr.msra.gmra.mxu1 %vm548_vm0, %v2921_v23 }
 0x15e   : > { %2425 = vmatpush3.bf16.msra.mxu0 %v2629_v26  ;;  %2433 = vmatpush3.bf16.msra.mxu1 %v2630_v27 }
 0x15f   : > { %2426 = vmatprep.subr.bf16.mxu0 %v2735_v9  ;;  %2434 = vmatprep.subr.bf16.mxu1 %v2735_v9 }
 0x160   : > { %2428 = vmatprep.mubr.msk.bf16.mxu0 %vm2736_vm1, %v2735_v9  ;;  %2436 = vmatprep.mubr.msk.bf16.mxu1 %vm2736_vm1, %v2735_v9 }
 0x162   : > { %2427 = vmatpush3.bf16.msra.mxu0 %v2631_v28  ;;  %2435 = vmatpush3.bf16.msra.mxu1 %v2632_v29 }
 0x163   : > { %2440 = vmatprep.subr.bf16.mxu0 %v2735_v9  ;;  %2448 = vmatprep.subr.bf16.mxu1 %v2735_v9 }
 0x165   : > { %2429 = vmatmul.mubr.msk.bf16.vlgmr.msra.gmra.mxu0 %vm548_vm0, %v2921_v23  ;;  %2437 = vmatmul.mubr.msk.bf16.vlgmr.msra.gmra.mxu1 %vm548_vm0, %v2921_v23 }
 0x166   : > { %2441 = vmatpush3.bf16.msra.mxu0 %v2633_v30  ;;  %2449 = vmatpush3.bf16.msra.mxu1 %v2634_v31 }
 0x167   : > { %2442 = vmatprep.subr.bf16.mxu0 %v2735_v9  ;;  %2450 = vmatprep.subr.bf16.mxu1 %v2735_v9 }
 0x168   : > { %2444 = vmatprep.mubr.msk.bf16.mxu0 %vm2736_vm1, %v2735_v9  ;;  %2452 = vmatprep.mubr.msk.bf16.mxu1 %vm2736_vm1, %v2735_v9 }
 0x16a   : > { %2443 = vmatpush3.bf16.msra.mxu0 %v2635_v32  ;;  %2451 = vmatpush3.bf16.msra.mxu1 %v2636_v33 }
 0x16b   : > { %2456 = vmatprep.subr.bf16.mxu0 %v2735_v9  ;;  %2464 = vmatprep.subr.bf16.mxu1 %v2735_v9 }
 0x16d   : > { %2445 = vmatmul.mubr.msk.bf16.vlgmr.msra.gmra.mxu0 %vm548_vm0, %v2921_v23  ;;  %2453 = vmatmul.mubr.msk.bf16.vlgmr.msra.gmra.mxu1 %vm548_vm0, %v2921_v23 }
 0x16e   : > { %2457 = vmatpush3.bf16.msra.mxu0 %v2637_v34  ;;  %2465 = vmatpush3.bf16.msra.mxu1 %v2638_v35 }
 0x16f   : > { %2458 = vmatprep.subr.bf16.mxu0 %v2735_v9  ;;  %2466 = vmatprep.subr.bf16.mxu1 %v2735_v9 }
 0x170   : > { %2460 = vmatprep.mubr.msk.bf16.mxu0 %vm2736_vm1, %v2735_v9  ;;  %2468 = vmatprep.mubr.msk.bf16.mxu1 %vm2736_vm1, %v2735_v9 }
 0x172   : > { %2459 = vmatpush3.bf16.msra.mxu0 %v2639_v36  ;;  %2467 = vmatpush3.bf16.msra.mxu1 %v2640_v37 }
 0x173   : > { %2472 = vmatprep.subr.bf16.mxu0 %v2735_v9  ;;  %2480 = vmatprep.subr.bf16.mxu1 %v2735_v9 }
 0x175   : > { %2461 = vmatmul.mubr.msk.bf16.vlgmr.msra.gmra.mxu0 %vm548_vm0, %v2921_v23  ;;  %2469 = vmatmul.mubr.msk.bf16.vlgmr.msra.gmra.mxu1 %vm548_vm0, %v2921_v23 }
 0x176   : > { %2473 = vmatpush3.bf16.msra.mxu0 %v2641_v38  ;;  %2481 = vmatpush3.bf16.msra.mxu1 %v2642_v39 }
 0x177   : > { %2474 = vmatprep.subr.bf16.mxu0 %v2735_v9  ;;  %2482 = vmatprep.subr.bf16.mxu1 %v2735_v9 }
 0x178   : > { %2476 = vmatprep.mubr.msk.bf16.mxu0 %vm2736_vm1, %v2735_v9  ;;  %2484 = vmatprep.mubr.msk.bf16.mxu1 %vm2736_vm1, %v2735_v9 }
 0x17a   : > { %2475 = vmatpush3.bf16.msra.mxu0 %v2643_v40  ;;  %2483 = vmatpush3.bf16.msra.mxu1 %v2644_v41  ;;  %v2279_v40 = vld [vmem:[%s3267_s8] ss:$0 sm:$0xff]  ;;  %v2280_v41 = vld [vmem:[%s3267_s8 + $0x1] ss:$0 sm:$0xff] }
 0x17b   : > { %2488 = vmatprep.subr.bf16.mxu0 %v2735_v9  ;;  %2494 = vmatprep.subr.bf16.mxu1 %v2735_v9 }
 0x17d   : > { %2477 = vmatmul.mubr.msk.bf16.vlgmr.msra.gmra.mxu0 %vm548_vm0, %v2921_v23  ;;  %2485 = vmatmul.mubr.msk.bf16.vlgmr.msra.gmra.mxu1 %vm548_vm0, %v2921_v23 }
 0x17e   : > { %2490 = vmatprep.mubr.msk.bf16.mxu0 %vm2736_vm1, %v2735_v9  ;;  %2496 = vmatprep.mubr.msk.bf16.mxu1 %vm2736_vm1, %v2735_v9 }
 0x215   : > { %v703_v42 = vpop.f32.mrf.mxu0  ;;  %v755_v43 = vpop.f32.mrf.mxu1 }
 0x216   : > { %v704_v3 = vadd.f32 %v2247_v60, %v703_v42  ;;  %v756_v4 = vadd.f32 %v2248_v61, %v755_v43 }
 0x217   : > { %v2398_v44 = vpop.f32.mrf.mxu0  ;;  %v2406_v45 = vpop.f32.mrf.mxu1 }
 0x218   : > { %v865_v15 = vmul.f32 0.35355338, %v704_v3  ;;  %v866_v16 = vmul.f32 0.35355338, %v756_v4 }
 0x219   : > { %v706_v46 = vpop.f32.mrf.mxu0  ;;  %v758_v47 = vpop.f32.mrf.mxu1 }
 0x21a   : > { %v1341_v26 = vpack.c.bf16 %v865_v15, %v865_v15  ;;  %v1342_v27 = vpack.c.bf16 %v866_v16, %v866_v16 }
 0x21b   : > { %v2399_v48 = vpop.f32.mrf.mxu0  ;;  %v2407_v49 = vpop.f32.mrf.mxu1 }
 0x21d   : > { %v807_v50 = vpop.f32.mrf.mxu0  ;;  %v859_v51 = vpop.f32.mrf.mxu1 }
 0x21e   : > { %v808_v30 = vadd.f32 %v2249_v20, %v807_v50  ;;  %v860_v31 = vadd.f32 %v2250_v21, %v859_v51 }
 0x21f   : > { %v2414_v52 = vpop.f32.mrf.mxu0  ;;  %v2422_v53 = vpop.f32.mrf.mxu1 }
 0x220   : > { %v867_v42 = vmul.f32 0.35355338, %v808_v30  ;;  %v868_v43 = vmul.f32 0.35355338, %v860_v31 }
 0x221   : > { %v810_v54 = vpop.f32.mrf.mxu0  ;;  %v862_v55 = vpop.f32.mrf.mxu1 }
 0x222   : > { %v1343_v50 = vpack.c.bf16 %v867_v42, %v867_v42  ;;  %v1344_v51 = vpack.c.bf16 %v868_v43, %v868_v43 }
 0x223   : > { %v2415_v56 = vpop.f32.mrf.mxu0  ;;  %v2423_v57 = vpop.f32.mrf.mxu1 }
 0x225   : > { %v943_v62 = vpop.f32.mrf.mxu0  ;;  %v995_v63 = vpop.f32.mrf.mxu1 }
 0x226   : > { %v944_v1 = vadd.f32 %v2263_v58, %v943_v62  ;;  %v996_v2 = vadd.f32 %v2264_v59, %v995_v63 }
 0x227   : > { %v2430_v5 = vpop.f32.mrf.mxu0  ;;  %v2438_v6 = vpop.f32.mrf.mxu1 }
 0x228   : > { %v1345_v7 = vpack.c.bf16 %v944_v1, %v944_v1  ;;  %v1346_v8 = vpack.c.bf16 %v996_v2, %v996_v2 }
 0x229   : > { %v946_v10 = vpop.f32.mrf.mxu0  ;;  %v998_v11 = vpop.f32.mrf.mxu1 }
 0x22a   : > { %v1354_v12 = vsel %vm1349_vm2, %v1345_v7, 0  ;;  %v1400_v13 = vsel %vm1349_vm2, %v1346_v8, 0 }
 0x22b   : > { %v2431_v17 = vpop.f32.mrf.mxu0  ;;  %v2439_v18 = vpop.f32.mrf.mxu1  ;;  %2489 = vmatpush3.bf16.xpose.msra.mxu0 %v1354_v12  ;;  %2495 = vmatpush3.bf16.xpose.msra.mxu1 %v1400_v13 }
 0x22c   : > { %2500 = vmatprep.subr.bf16.mxu0 %v2735_v9  ;;  %2506 = vmatprep.subr.bf16.mxu1 %v2735_v9 }
 0x22d   : > { %v1047_v22 = vpop.f32.mrf.mxu0  ;;  %v1099_v23 = vpop.f32.mrf.mxu1 }
 0x22e   : > { %v1048_v24 = vadd.f32 %v2265_v14, %v1047_v22  ;;  %v1100_v25 = vadd.f32 %v2266_v19, %v1099_v23 }
 0x22f   : > { %v2446_v28 = vpop.f32.mrf.mxu0  ;;  %v2454_v29 = vpop.f32.mrf.mxu1 }
 0x230   : > { %v1347_v32 = vpack.c.bf16 %v1048_v24, %v1048_v24  ;;  %v1348_v33 = vpack.c.bf16 %v1100_v25, %v1100_v25 }
 0x231   : > { %v1050_v34 = vpop.f32.mrf.mxu0  ;;  %v1102_v35 = vpop.f32.mrf.mxu1 }
 0x232   : > { %v1446_v36 = vsel %vm1349_vm2, %v1347_v32, 0  ;;  %v1492_v37 = vsel %vm1349_vm2, %v1348_v33, 0  ;;  %2491 = vmatmul.mubr.msk.bf16.vlgmr.msra.gmra.mxu0 %vm1349_vm2, %v1341_v26  ;;  %2497 = vmatmul.mubr.msk.bf16.vlgmr.msra.gmra.mxu1 %vm1349_vm2, %v1342_v27 }
 0x233   : > { %v2447_v38 = vpop.f32.mrf.mxu0  ;;  %v2455_v39 = vpop.f32.mrf.mxu1  ;;  %2501 = vmatpush3.bf16.xpose.msra.mxu0 %v1446_v36  ;;  %2507 = vmatpush3.bf16.xpose.msra.mxu1 %v1492_v37 }
 0x234   : > { %2502 = vmatprep.mubr.msk.bf16.mxu0 %vm2736_vm1, %v2735_v9  ;;  %2508 = vmatprep.mubr.msk.bf16.mxu1 %vm2736_vm1, %v2735_v9 }
 0x235   : > { %v1179_v44 = vpop.f32.mrf.mxu0  ;;  %v1231_v45 = vpop.f32.mrf.mxu1  ;;  %2512 = vmatprep.subr.bf16.mxu0 %v2735_v9  ;;  %2518 = vmatprep.subr.bf16.mxu1 %v2735_v9 }
 0x236   : > { %v1180_v46 = vadd.f32 %v2279_v40, %v1179_v44  ;;  %v1232_v47 = vadd.f32 %v2280_v41, %v1231_v45 }
 0x237   : > { %v2462_v48 = vpop.f32.mrf.mxu0  ;;  %v2470_v49 = vpop.f32.mrf.mxu1 }
 0x238   : > { %v1582_v52 = vpack.c.bf16 %v1180_v46, %v1180_v46  ;;  %v1583_v53 = vpack.c.bf16 %v1232_v47, %v1232_v47  ;;  %v2281_v48 = vld [vmem:[%s3267_s8 + $0x2] ss:$0 sm:$0xff] }
 0x239   : > { %v1182_v54 = vpop.f32.mrf.mxu0  ;;  %v1234_v55 = vpop.f32.mrf.mxu1 }
 0x23a   : > { %v1591_v56 = vsel %vm1589_vm3, %v1582_v52, 0  ;;  %v1637_v57 = vsel %vm1589_vm3, %v1583_v53, 0  ;;  %2503 = vmatmul.mubr.msk.bf16.vlgmr.msra.gmra.mxu0 %vm1349_vm2, %v1343_v50  ;;  %2509 = vmatmul.mubr.msk.bf16.vlgmr.msra.gmra.mxu1 %vm1349_vm2, %v1344_v51  ;;  %v2282_v52 = vld [vmem:[%s3267_s8 + $0x3] ss:$0 sm:$0xff] }
 0x23b   : > { %v2463_v58 = vpop.f32.mrf.mxu0  ;;  %v2471_v59 = vpop.f32.mrf.mxu1  ;;  %2513 = vmatpush3.bf16.msra.mxu0 %v1591_v56  ;;  %2519 = vmatpush3.bf16.msra.mxu1 %v1637_v57 }
 0x23c   : > { %2514 = vmatprep.mubr.msk.bf16.mxu0 %vm2736_vm1, %v2735_v9  ;;  %2524 = vmatprep.subr.bf16.mxu0 %v2735_v9 }
 0x23d   : > { %v3096_v60 = vpop.f32.mrf.mxu0  ;;  %v3098_v61 = vpop.f32.mrf.mxu1  ;;  %2520 = vmatprep.mubr.msk.bf16.mxu1 %vm2736_vm1, %v2735_v9  ;;  %2530 = vmatprep.subr.bf16.mxu1 %v2735_v9 }
 0x23e   : > { %v1284_v51 = vadd.f32 %v2281_v48, %v3096_v60  ;;  %v1336_v55 = vadd.f32 %v2282_v52, %v3098_v61 }
 0x23f   : > { %v2478_v62 = vpop.f32.mrf.mxu0  ;;  %v2486_v63 = vpop.f32.mrf.mxu1 }
 0x240   : > { %v1584_v54 = vpack.c.bf16 %v1284_v51, %v1284_v51  ;;  %v1585_v62 = vpack.c.bf16 %v1336_v55, %v1336_v55 }
 0x241   : > { %v1286_v1 = vpop.f32.mrf.mxu0  ;;  %v1338_v2 = vpop.f32.mrf.mxu1 }
 0x242   : > { %v1683_v59 = vsel %vm1589_vm3, %v1584_v54, 0  ;;  %v1729_v61 = vsel %vm1589_vm3, %v1585_v62, 0  ;;  %v2307_v54 = vld [vmem:[%s3269_s10] ss:$0 sm:$0xff] }
 0x243   : > { %v2479_v3 = vpop.f32.mrf.mxu0  ;;  %v2487_v4 = vpop.f32.mrf.mxu1 }
 0x244   : > { %v1775_v3 = vld [vmem:[%s3268_s9] sm:$0xf] }
 0x2f2   : > { %v1390_v5 = vpop.f32.mrf.mxu0  ;;  %v1436_v6 = vpop.f32.mrf.mxu1 }
 0x2f3   : > { %v1534_v7 = vsel %vm1349_vm2, %v1390_v5, -inf  ;;  %v1537_v13 = vsel %vm1349_vm2, %v1436_v6, -inf }
 0x2f4   : > { %v2498_v8 = vpop.f32.mrf.mxu1  ;;  %1535 = vmax.xlane.f32.xlu1 %v1534_v7  ;;  %v2492_v10 = vpop.f32.mrf.mxu0  ;;  %v1783_v7 = vsel %vm1589_vm3, %v1775_v3, 0 }
 0x2f5   : > { %v1776_v10 = vld [vmem:[%s3268_s9 + $0x4] sm:$0xf] }
 0x2f6   : > { %v1393_v11 = vpop.f32.mrf.mxu0  ;;  %v1439_v12 = vpop.f32.mrf.mxu1 }
 0x2f7   : > { %v1829_v11 = vsel %vm1589_vm3, %v1776_v10, 0  ;;  %v1777_v12 = vld [vmem:[%s3268_s9 + $0x8] sm:$0xf] }
 0x2f8   : > { %v2499_v14 = vpop.f32.mrf.mxu1  ;;  %1538 = vmax.xlane.f32.xlu1 %v1537_v13  ;;  %v2493_v15 = vpop.f32.mrf.mxu0 }
 0x2f9   : > { %v1875_v15 = vsel %vm1589_vm3, %v1777_v12, 0 }
 0x2fa   : > { %v1482_v16 = vpop.f32.mrf.mxu0  ;;  %v1528_v17 = vpop.f32.mrf.mxu1 }
 0x2fb   : > { %v1543_v18 = vsel %vm1349_vm2, %v1528_v17, -inf  ;;  %v1540_v19 = vsel %vm1349_vm2, %v1482_v16, -inf }
 0x2fc   : > { %v2510_v20 = vpop.f32.mrf.mxu1  ;;  %1544 = vmax.xlane.f32.xlu1 %v1543_v18  ;;  %1541 = vmax.xlane.f32.xlu0 %v1540_v19  ;;  %v2504_v21 = vpop.f32.mrf.mxu0 }
 0x2fe   : > { %v1485_v22 = vpop.f32.mrf.mxu0  ;;  %v1531_v23 = vpop.f32.mrf.mxu1 }
 0x300   : > { %v2505_v24 = vpop.f32.mrf.mxu0  ;;  %v2511_v25 = vpop.f32.mrf.mxu1 }
 0x37d   : > { %v1536_v26 = vpop.xlane.xlu1 %1535 }
 0x37e   : > { %v1546_v27 = vsub.f32 %v1390_v5, %v1536_v26 }
 0x380   : > { %v1550_v28 = vmul.f32 1.442695, %v1546_v27 }
 0x381   : > { %v1539_v29 = vpop.xlane.xlu1 %1538 }
 0x382   : > { %2653 = vpow2.f32 %v1550_v28  ;;  %v1547_v30 = vsub.f32 %v1436_v6, %v1539_v29 }
 0x384   : > { %v1552_v31 = vmul.f32 1.442695, %v1547_v30 }
 0x385   : > { %v1545_v32 = vpop.xlane.xlu1 %1544  ;;  %v1542_v33 = vpop.xlane.xlu0 %1541 }
 0x386   : > { %2655 = vpow2.f32 %v1552_v31  ;;  %v1549_v34 = vsub.f32 %v1528_v17, %v1545_v32  ;;  %v1548_v35 = vsub.f32 %v1482_v16, %v1542_v33  ;;  %v1778_v17 = vld [vmem:[%s3268_s9 + $0xc] sm:$0xf] }
 0x387   : > { %v1921_v21 = vsel %vm1589_vm3, %v1778_v17, 0  ;;  %v2647_v17 = vld [vmem:[%s3274_s15 + $0x18] sm:$0xff]  }
 0x388   : > { %v1556_v36 = vmul.f32 1.442695, %v1549_v34  ;;  %v1554_v37 = vmul.f32 1.442695, %v1548_v35 }
 0x38a   : > { %2657 = vpow2.f32 %v1556_v36 }
 0x38b   : > { %2659 = vpow2.f32 %v1554_v37 }
 0x38f   : > { %v2654_v38 = vpop.eup %2653 }
 0x390   : > { %v1558_v39 = vsel %vm1349_vm2, %v2654_v38, 0.0 }
 0x391   : > { %1559 = vadd.xlane.f32.xlu0 %v1558_v39 }
 0x393   : > { %v2656_v40 = vpop.eup %2655 }
 0x394   : > { %v1561_v41 = vsel %vm1349_vm2, %v2656_v40, 0.0 }
 0x395   : > { %1562 = vadd.xlane.f32.xlu1 %v1561_v41 }
 0x397   : > { %v2658_v42 = vpop.eup %2657 }
 0x398   : > { %v2660_v43 = vpop.eup %2659  ;;  %v1567_v44 = vsel %vm1349_vm2, %v2658_v42, 0.0 }
 0x399   : > { %1568 = vadd.xlane.f32.xlu1 %v1567_v44  ;;  %v1564_v45 = vsel %vm1349_vm2, %v2660_v43, 0.0 }
 0x39a   : > { %1565 = vadd.xlane.f32.xlu0 %v1564_v45 }
 0x41a   : > { %v1560_v46 = vpop.xlane.xlu0 %1559 }
 0x41b   : > { %2661 = vrcp.f32 %v1560_v46 }
 0x41e   : > { %v1563_v47 = vpop.xlane.xlu1 %1562 }
 0x41f   : > { %2663 = vrcp.f32 %v1563_v47 }
 0x422   : > { %v1569_v49 = vpop.xlane.xlu1 %1568 }
 0x423   : > { %2665 = vrcp.f32 %v1569_v49  ;;  %v1566_v50 = vpop.xlane.xlu0 %1565 }
 0x424   : > { %2667 = vrcp.f32 %v1566_v50 }
 0x428   : > { %v2662_v53 = vpop.eup %2661 }
 0x429   : > { %v1574_v56 = vmul.f32 %v2662_v53, %v2654_v38 }
 0x42b   : > { %v1578_v57 = vpack.c.bf16 %v1574_v56, %v1574_v56 }
 0x42c   : > { %v2664_v58 = vpop.eup %2663 }
 0x42d   : > { %2515 = vmatmul.mubr.msk.bf16.vlgmr.msra.gmra.mxu0 %vm1349_vm2, %v1578_v57  ;;  %v1575_v63 = vmul.f32 %v2664_v58, %v2656_v40 }
 0x42e   : > { %2525 = vmatpush3.bf16.msra.mxu0 %v1683_v59  ;;  %2526 = vmatprep.mubr.msk.bf16.mxu0 %vm2736_vm1, %v2735_v9 }
 0x42f   : > { %v1579_v60 = vpack.c.bf16 %v1575_v63, %v1575_v63  ;;  %2536 = vmatprep.subr.bf16.mxu0 %v2735_v9 }
 0x430   : > { %v2666_v1 = vpop.eup %2665 }
 0x431   : > { %v2668_v2 = vpop.eup %2667  ;;  %2521 = vmatmul.mubr.msk.bf16.vlgmr.msra.gmra.mxu1 %vm1349_vm2, %v1579_v60  ;;  %v1577_v5 = vmul.f32 %v2666_v1, %v2658_v42 }
 0x432   : > { %2531 = vmatpush3.bf16.msra.mxu1 %v1729_v61  ;;  %v1576_v4 = vmul.f32 %v2668_v2, %v2660_v43  ;;  %2532 = vmatprep.mubr.msk.bf16.mxu1 %vm2736_vm1, %v2735_v9 }
 0x433   : > { %2542 = vmatprep.subr.bf16.mxu1 %v2735_v9  ;;  %v1581_v8 = vpack.c.bf16 %v1577_v5, %v1577_v5  ;;  %v2645_v5 = vld [vmem:[%s3272_s13 + $0x8] sm:$0xff]  }
 0x434   : > { %v1580_v6 = vpack.c.bf16 %v1576_v4, %v1576_v4 }
 0x436   : > { %2527 = vmatmul.mubr.msk.bf16.vlgmr.msra.gmra.mxu0 %vm1349_vm2, %v1580_v6  ;;  %v2646_v6 = vld [vmem:[%s3272_s13] sm:$0xff]  }
 0x437   : > { %2537 = vmatpush3.bf16.msra.mxu0 %v1783_v7  ;;  %2538 = vmatprep.mubr.msk.bf16.mxu0 %vm2736_vm1, %v2735_v9 }
 0x438   : > { %2548 = vmatprep.subr.bf16.mxu0 %v2735_v9 }
 0x439   : > { %2533 = vmatmul.mubr.msk.bf16.vlgmr.msra.gmra.mxu1 %vm1349_vm2, %v1581_v8 }
 0x43a   : > { %2544 = vmatprep.mubr.msk.bf16.mxu1 %vm2736_vm1, %v2735_v9  ;;  %2543 = vmatpush3.bf16.msra.mxu1 %v1829_v11  ;;  %v2308_v11 = vld [vmem:[%s3270_s11] ss:$0 sm:$0xff] }
 0x43b   : > { %2554 = vmatprep.subr.bf16.mxu1 %v2735_v9 }
 0x4ed   : > { %v1627_v13 = vpop.f32.mrf.mxu0 }
 0x4ee   : > { %v1771_v14 = vpack.c.bf16 %v1627_v13, %v1627_v13  ;;  %v2309_v13 = vld [vmem:[%s3271_s12] ss:$0 sm:$0xff] }
 0x4ef   : > { %v2516_v16 = vpop.f32.mrf.mxu0 }
 0x4f0   : > { %2539 = vmatmul.mubr.msk.bf16.vlgmr.msra.gmra.mxu0 %vm1349_vm2, %v1771_v14 }
 0x4f1   : > { %v1630_v18 = vpop.f32.mrf.mxu0  ;;  %v1673_v19 = vpop.f32.mrf.mxu1  ;;  %2549 = vmatpush3.bf16.msra.mxu0 %v1875_v15  ;;  %2550 = vmatprep.mubr.msk.bf16.mxu0 %vm2736_vm1, %v2735_v9 }
 0x4f2   : > { %v1772_v20 = vpack.c.bf16 %v1673_v19, %v1673_v19  ;;  %2560 = vmatprep.subr.bf16.mxu0 %v2735_v9  ;;  %v2648_v18 = vld [vmem:[%s3274_s15 + $0x10] sm:$0xff]   ;;  %v2649_v19 = vld [vmem:[%s3274_s15 + $0x8] sm:$0xff]  }
 0x4f3   : > { %v2517_v22 = vpop.f32.mrf.mxu0  ;;  %v2522_v23 = vpop.f32.mrf.mxu1 }
 0x4f4   : > { %2545 = vmatmul.mubr.msk.bf16.vlgmr.msra.gmra.mxu1 %vm1349_vm2, %v1772_v20  ;;  %v2650_v20 = vld [vmem:[%s3274_s15] sm:$0xff]  }
 0x4f5   : > { %v1676_v24 = vpop.f32.mrf.mxu1  ;;  %2555 = vmatpush3.bf16.msra.mxu1 %v1921_v21  ;;  %2556 = vmatprep.mubr.msk.bf16.mxu1 %vm2736_vm1, %v2735_v9  ;;  %v2310_v21 = vld [vmem:[%s3273_s14] ss:$0 sm:$0xff] }
 0x4f6   : > { %v1719_v25 = vpop.f32.mrf.mxu0  ;;  %2568 = vmatprep.subr.bf16.mxu1 %v2735_v9 }
 0x4f7   : > { %v1773_v26 = vpack.c.bf16 %v1719_v25, %v1719_v25  ;;  %v2523_v27 = vpop.f32.mrf.mxu1 }
 0x4f8   : > { %v2528_v28 = vpop.f32.mrf.mxu0 }
 0x4f9   : > { %2551 = vmatmul.mubr.msk.bf16.vlgmr.msra.gmra.mxu0 %vm1349_vm2, %v1773_v26  ;;  %v1765_v29 = vpop.f32.mrf.mxu1 }
 0x4fa   : > { %v1722_v30 = vpop.f32.mrf.mxu0  ;;  %v1774_v31 = vpack.c.bf16 %v1765_v29, %v1765_v29  ;;  %2564 = vmatprep.mubr.msk.bf16.mxu0 %vm2736_vm1, %v2735_v9  ;;  %2561 = vmatpush3.bf16.msra.mxu0 %v2645_v5 }
 0x4fb   : > { %v2534_v32 = vpop.f32.mrf.mxu1  ;;  %2562 = vmatprep.subr.bf16.mxu0 %v2735_v9 }
 0x4fc   : > { %v2529_v33 = vpop.f32.mrf.mxu0  ;;  %2557 = vmatmul.mubr.msk.bf16.vlgmr.msra.gmra.mxu1 %vm1349_vm2, %v1774_v31  ;;  %v2314_v32 = vld [vmem:[%s3275_s16] ss:$0 sm:$0xff] }
 0x4fd   : > { %v1768_v34 = vpop.f32.mrf.mxu1  ;;  %2576 = vmatprep.mubr.msk.bf16.mxu1 %vm2736_vm1, %v2735_v9  ;;  %2569 = vmatpush3.bf16.msra.mxu1 %v2647_v17 }
 0x4fe   : > { %2563 = vmatpush3.bf16.msra.mxu0 %v2646_v6  ;;  %2570 = vmatprep.subr.bf16.mxu1 %v2735_v9 }
 0x4ff   : > { %v2535_v35 = vpop.f32.mrf.mxu1 }
 0x501   : > { %2571 = vmatpush3.bf16.msra.mxu1 %v2648_v18 }
 0x502   : > { %2572 = vmatprep.subr.bf16.mxu1 %v2735_v9 }
 0x505   : > { %2573 = vmatpush3.bf16.msra.mxu1 %v2649_v19 }
 0x506   : > { %2574 = vmatprep.subr.bf16.mxu1 %v2735_v9 }
 0x509   : > { %2575 = vmatpush3.bf16.msra.mxu1 %v2650_v20 }
 0x5b0   : > { %v1819_v36 = vpop.f32.mrf.mxu0 }
 0x5b1   : > { %v1963_v44 = vsel %vm548_vm0, %v1819_v36, 0.0 }
 0x5b2   : > { %v2540_v37 = vpop.f32.mrf.mxu0 }
 0x5b4   : > { %v1822_v38 = vpop.f32.mrf.mxu0  ;;  %v1865_v39 = vpop.f32.mrf.mxu1 }
 0x5b5   : > { %v1964_v42 = vsel %vm548_vm0, %v1865_v39, 0.0 }
 0x5b6   : > { %v2541_v40 = vpop.f32.mrf.mxu0  ;;  %v2546_v41 = vpop.f32.mrf.mxu1  ;;  %v1965_v46 = vadd.f32 %v1964_v42, %v1963_v44 }
 0x5b8   : > { %v1868_v43 = vpop.f32.mrf.mxu1 }
 0x5b9   : > { %v1911_v45 = vpop.f32.mrf.mxu0 }
 0x5ba   : > { %v1966_v47 = vsel %vm548_vm0, %v1911_v45, 0.0  ;;  %v2547_v48 = vpop.f32.mrf.mxu1 }
 0x5bb   : > { %v2552_v49 = vpop.f32.mrf.mxu0  ;;  %v1967_v50 = vadd.f32 %v1966_v47, %v1965_v46 }
 0x5bc   : > { %v1957_v51 = vpop.f32.mrf.mxu1 }
 0x5bd   : > { %v1914_v52 = vpop.f32.mrf.mxu0  ;;  %v1968_v53 = vsel %vm548_vm0, %v1957_v51, 0.0 }
 0x5be   : > { %v1969_v55 = vadd.f32 %v1968_v53, %v1967_v50  ;;  %v2558_v56 = vpop.f32.mrf.mxu1 }
 0x5bf   : > { %v2553_v57 = vpop.f32.mrf.mxu0 }
 0x5c0   : > { %v1977_v58 = vadd.f32 %v2307_v54, %v1969_v55  ;;  %v1960_v59 = vpop.f32.mrf.mxu1 }
 0x5c2   : > { %v2559_v62 = vpop.f32.mrf.mxu1  ;;  %v1978_v63 = vadd.f32 %v1977_v58, %v2881_v0 }
 0x5c4   : > { %v1981_v60 = vsel %vm548_vm0, %v1978_v63, 0.0 }
 0x5c5   : > { %1982 = vadd.xlane.f32.xlu0 %v1981_v60 }
 0x64e   : > { %v1983_v1 = vpop.xlane.xlu0 %1982 }
 0x64f   : > { %v1984_v2 = vmul.f32 0.03125, %v1983_v1 }
 0x651   : > { %v1985_v61 = vsub.f32 %v1978_v63, %v1984_v2 }
 0x653   : > { %v1986_v3 = vmul.f32 %v1985_v61, %v1985_v61 }
 0x655   : > { %v1987_v4 = vsel %vm548_vm0, %v1986_v3, 0.0 }
 0x656   : > { %1988 = vadd.xlane.f32.xlu1 %v1987_v4 }
 0x6df   : > { %v1989_v0 = vpop.xlane.xlu1 %1988 }
 0x6e0   : > { %v1990_v7 = vmul.f32 0.03125, %v1989_v0 }
 0x6e2   : > { %v1991_v8 = vadd.f32 1e-05, %v1990_v7 }
 0x6e4   : > { %2669 = vrsqrt.f32 %v1991_v8 }
 0x6f1   : > { %v2670_v10 = vpop.eup %2669 }
 0x6f2   : > { %v1993_v12 = vmul.f32 %v2670_v10, %v1985_v61 }
 0x6f4   : > { %v2000_v14 = vmul.f32 %v2308_v11, %v1993_v12 }
 0x6f6   : > { %v2007_v15 = vadd.f32 %v2309_v13, %v2000_v14 }
 0x6f8   : > { %v2008_v16 = vpack.c.bf16 %v2007_v15, %v2007_v15 }
 0x6fa   : > { %2565 = vmatmul.mubr.msk.bf16.vlgmr.msra.gmra.mxu0 %vm548_vm0, %v2008_v16 }
 0x7ba   : > { %v2069_v22 = vpop.f32.mrf.mxu0 }
 0x7bb   : > { %v2070_v23 = vadd.f32 %v2310_v21, %v2069_v22 }
 0x7bc   : > { %v2566_v24 = vpop.f32.mrf.mxu0 }
 0x7bd   : > { %v2076_v25 = vmul.f32 0.70710677, %v2070_v23  ;;  %v2075_v9 = vmul.f32 0.5, %v2070_v23 }
 0x7be   : > { %v2072_v26 = vpop.f32.mrf.mxu0 }
 0x7bf   : > { %2671 = verf.f32 %v2076_v25 }
 0x7c0   : > { %v2567_v27 = vpop.f32.mrf.mxu0 }
 0x7cc   : > { %v2672_v28 = vpop.eup %2671 }
 0x7cd   : > { %v2078_v29 = vadd.f32 1.0, %v2672_v28 }
 0x7cf   : > { %v2079_v30 = vmul.f32 %v2078_v29, %v2075_v9 }
 0x7d1   : > { %v2080_v31 = vpack.c.bf16 %v2079_v30, %v2079_v30 }
 0x7d3   : > { %2577 = vmatmul.mubr.msk.bf16.vlgmr.msra.gmra.mxu1 %vm2120_vm4, %v2080_v31 }
 0x893   : > { %v2158_v33 = vpop.f32.mrf.mxu1 }
 0x894   : > { %v2159_v34 = vadd.f32 %v2314_v32, %v2158_v33 }
 0x895   : > { %v2578_v35 = vpop.f32.mrf.mxu1 }
 0x896   : > { %v2164_v36 = vadd.f32 %v2159_v34, %v1978_v63 }
 0x897   : > { %v2161_v37 = vpop.f32.mrf.mxu1 }
 0x898   : > { %2165 = vst.msk [vmem:[%s539_s29] sm:$0xff] %vm548_vm0, %v2164_v36 }
 0x899   : > { %v2579_v38 = vpop.f32.mrf.mxu1 }
 0x89a   : > { %2686 = shalt.err (!%p2683_p3)
}
 0x89b   : > { %s2687_s29 = scalar_lea.hbm %s3217_s2, 128  ;;  %s2691_s30 = scalar_lea.hbm %s3276_s17, 256 }
 0x89c   : > { %p2688_p4 = scmp.ne.s32.totalorder %s3217_s2, %s2687_s29  ;;  %p2692_p9 = scmp.lt.s32.totalorder %s3217_s2, %s3276_s17 }
 0x89d   : > { %p2693_p10 = scmp.lt.s32.totalorder %s2691_s30, %s2687_s29 }
 0x89e   : > { %p2689_p7 = pnand %p2688_p4, %p2866_p5 }
 0x89f   : > { %p2694_p11 = por %p2693_p10, %p2692_p9 }
 0x8a0   : > { %p2690_p8 = pneg %p2689_p7 }
 0x8a2   : > { %p2695_p12 = pnand %p2694_p11, %p2690_p8 }
 0x8a4   : > { %2698 = shalt.err (!%p2695_p12)
}
 0x8a5   : > { %2580 = dma.vmem_to_hbm [thread:$0]  (%p2866_p5), %s3219_s26, 128, %s3217_s2, %s2167_s28  }
 0x8a6 PF: > { %p2586_p13 = scmp.ge.s32.totalorder %s2733_s27, 2  ;;  %s2192_s18 = sand.u32 1, %s2721_s24  }
 0x8a7   : > { %s2193_s3 = scalar_lea.sflag [#allocation3], %s2192_s18 }
 0x8a8   : > { %p2583_p0 = pnand %p2586_p13, %p2870_p6 }
 0x8aa   : > { %p2584_p1 = pneg %p2583_p0 }
 0x8ac   : > { %2716 = dma.done.wait (%p2584_p1), %s2193_s3, 128  }
 0x8ad   : > { %2718 = vsyncadd (%p2584_p1), %s2193_s3, 4294967168  ;;  %s3293_s27 = sld [smem:[#allocation6_spill]]  ;;  %s3296_s24 = smov %s2725_s25 }
 0x8ae   : > { %s3294_s23 = sld [smem:[#allocation5_spill]] }
 0x8af   : > { %s3295_s26 = sld [smem:[#allocation7_spill]] }
 0x8b3   : > { %p27_p2 = scmp.ge.s32.totalorder %s3293_s27, 4  }
 0x8b4   : > { %s3297_s25 = smov %s3294_s23 }
 0x8b5   :  { %29 = sbr.rel (!%p27_p2) target bundleno = 8 (0x8), region = 123 }
 0x8ba   :  { %2198 = vsyncpa [#allocation3], 1 }
 0x8bb   :  { %2200 = vsyncpa [#allocation3 + $0x1], 1 }

// kernel: tpu_custom_call.1
= control target key start
LH: loop header
LB: loop body
LE: loop exit
PB: predicated region body
PF: predicated region fallthrough
CT: control target
= control target key end

     0   :  { %s3259_s0 = inlined_call_operand.vmem [shape: f32[2,8,32], index: 0, kind: input, shape index: {}]   ;;  %s3260_s1 = inlined_call_operand.vmem [shape: f32[1,32], index: 1, kind: input, shape index: {}]   ;;  %s3261_s2 = inlined_call_operand.vmem [shape: f32[1,32], index: 2, kind: input, shape index: {}]   ;;  %s3262_s3 = inlined_call_operand.vmem [shape: bf16[4,32,8], index: 3, kind: input, shape index: {}]   ;;  %s3263_s4 = inlined_call_operand.vmem [shape: bf16[4,32,8], index: 4, kind: input, shape index: {}]   ;;  %s3264_s5 = inlined_call_operand.vmem [shape: bf16[4,32,8], index: 5, kind: input, shape index: {}]   ;;  %s3265_s6 = inlined_call_operand.vmem [shape: f32[4,1,8], index: 6, kind: input, shape index: {}]   ;;  %s3266_s7 = inlined_call_operand.vmem [shape: f32[4,1,8], index: 7, kind: input, shape index: {}]   ;;  %s3267_s8 = inlined_call_operand.vmem [shape: f32[4,1,8], index: 8, kind: input, shape index: {}]   ;;  %s3268_s9 = inlined_call_operand.vmem [shape: bf16[4,8,32], index: 9, kind: input, shape index: {}]   ;;  %s3269_s10 = inlined_call_operand.vmem [shape: f32[1,32], index: 10, kind: input, shape index: {}]   ;;  %s3270_s11 = inlined_call_operand.vmem [shape: f32[1,32], index: 11, kind: input, shape index: {}]   ;;  %s3271_s12 = inlined_call_operand.vmem [shape: f32[1,32], index: 12, kind: input, shape index: {}]   ;;  %s3272_s13 = inlined_call_operand.vmem [shape: bf16[32,64], index: 13, kind: input, shape index: {}]   ;;  %s3273_s14 = inlined_call_operand.vmem [shape: f32[1,64], index: 14, kind: input, shape index: {}]   ;;  %s3274_s15 = inlined_call_operand.vmem [shape: bf16[64,32], index: 15, kind: input, shape index: {}]   ;;  %s3275_s16 = inlined_call_operand.vmem [shape: f32[1,32], index: 16, kind: input, shape index: {}]   ;;  %s3276_s17 = inlined_call_operand.hbm [shape: f32[2,8,32], index: 17, kind: output, shape index: {}]  }
   0x1   :  { %3280 = sst [smem:[#allocation8_spill]] %s3259_s0 }
   0x2   :  { %3281 = sst [smem:[#allocation9_spill]] %s3260_s1 }
   0x3   :  { %3282 = sst [smem:[#allocation10_spill]] %s3261_s2 }
   0x4   :  { %3283 = sst [smem:[#allocation11_spill]] %s3262_s3 }
   0x5   :  { %22 = vsyncpa [#allocation3], 0 }
   0x6   :  { %24 = vsyncpa [#allocation3 + $0x1], 0  ;;  %s2828_s24 = smov 0   ;;  %s2830_s25 = smov 0  }
   0x7   :  { %s2832_s26 = smov 0   ;;  %s2834_s27 = smov 0  }
   0x8 LB: > { %3284 = sst [smem:[#allocation5_spill]] %s2729_s26  ;;  %s2849_s28 = sadd.s32 4294967295, %s2733_s27   ;;  %s2733_s27 = sphi %s2834_s27, %s3293_s27   ;;  %s2729_s26 = sphi %s2832_s26, %s3295_s26   ;;  %s2725_s25 = sphi %s2830_s25, %s3297_s25   ;;  %s2721_s24 = sphi %s2828_s24, %s3296_s24  }
   0x9   : > { %s2239_s29 = sadd.s32 4294967294, %s2733_s27   ;;  %s2853_s0 = sadd.s32 1, %s2733_s27  }
   0xa   : > { %3285 = sst [smem:[#allocation6_spill]] %s2853_s0  ;;  %s399_s30 = sadd.s32 1, %s2729_s26 }
   0xb   : > { %s396_s18 = ssub.s32 %s2733_s27, %s2853_s0  ;;  %p409_p0 = scmp.ne.s32.totalorder %s2729_s26, %s2725_s25 }
   0xc   : > { %p397_p1 = scmp.eq.s32.totalorder %s396_s18, 0  ;;  %p410_p2 = scmp.eq.s32.totalorder %s2849_s28, 1 }
   0xd   : > { %p415_p3 = scmp.ne.s32.totalorder %s2725_s25, %s2721_s24  ;;  %p416_p4 = scmp.eq.s32.totalorder %s2239_s29, 1 }
   0xe   : > { %s2864_s19 = scalar_select %p397_p1, %s2729_s26, %s399_s30  }
   0xf   : > { %p2866_p5 = por %p410_p2, %p409_p0  ;;  %p2870_p6 = por %p416_p4, %p415_p3 }
  0x10   : > { %3286 = sst [smem:[#allocation7_spill]] %s2864_s19  ;;  %p2242_p7 = scmp.ge.s32.totalorder %s2733_s27, 1 }
  0x11   : > { %p489_p8 = scmp.lt.s32.totalorder %s2733_s27, 3 }
  0x13   : > { %p490_p9 = pnand %p2242_p7, %p489_p8 }
  0x14   : > { %p540_p10 = scmp.lt.s32.totalorder (!%p490_p9), %s2849_s28, 1  ;;  %s3289_s30 = sld [smem:[#allocation8_spill]] (!%p490_p9) }
  0x15   : > { %493 = sbr.rel (%p490_p9) target bundleno = 2214 (0x8a6), region = 88  ;;  %s3290_s3 = sld [smem:[#allocation11_spill]] (!%p490_p9) }
  0x16   : > { %s3292_s2 = sld [smem:[#allocation10_spill]] (!%p490_p9)  ;;  %s537_s19 = sand.u32 (!%p490_p9), 1, %s2725_s25  }
  0x1a   : > { %s541_s21 = scalar_select %p540_p10, %s2849_s28, 1  ;;  %vm548_vm0 = vcmask 261120   ;;  %v2735_v9 = vmov 0.0   ;;  %vm2736_vm1 = vmmov 0   ;;  %v2629_v26 = vld [vmem:[%s3263_s4 + $0x8] sm:$0xff]   ;;  %v2630_v27 = vld [vmem:[%s3263_s4 + $0x18] sm:$0xff]  }
  0x1b   : > { %v2621_v7 = vld [vmem:[%s3290_s3 + $0x8] sm:$0xff]   ;;  %v2622_v8 = vld [vmem:[%s3290_s3 + $0x18] sm:$0xff]   ;;  %2392 = vmatprep.subr.bf16.mxu0 %v2735_v9  ;;  %2400 = vmatprep.subr.bf16.mxu1 %v2735_v9  ;;  %v2623_v10 = vld [vmem:[%s3290_s3] sm:$0xff]   ;;  %vm1349_vm2 = vcmask 64512   ;;  %vm1589_vm3 = vcmask 1043456   ;;  %vm2120_vm4 = vcmask 523264  }
  0x1c   : > { %s2244_s22 = sshll.u32 %s541_s21, 3  ;;  %2393 = vmatpush3.bf16.msra.mxu0 %v2621_v7  ;;  %2401 = vmatpush3.bf16.msra.mxu1 %v2622_v8  ;;  %v2624_v11 = vld [vmem:[%s3290_s3 + $0x10] sm:$0xff]   ;;  %v2246_v18 = vld [vmem:[%s3292_s2] ss:$0 sm:$0xff]  ;;  %v2625_v21 = vld [vmem:[%s3290_s3 + $0x28] sm:$0xff]   ;;  %s2737_s21 = smov [#allocation2]  }
  0x1d   : > { %s543_s18 = scalar_lea.vmem %s3289_s30, %s2244_s22  ;;  %2394 = vmatprep.subr.bf16.mxu0 %v2735_v9  ;;  %2402 = vmatprep.subr.bf16.mxu1 %v2735_v9  ;;  %s3291_s22 = sld [smem:[#allocation9_spill]]  ;;  %v2626_v22 = vld [vmem:[%s3290_s3 + $0x38] sm:$0xff]   ;;  %v2627_v24 = vld [vmem:[%s3290_s3 + $0x20] sm:$0xff]   ;;  %v2628_v25 = vld [vmem:[%s3290_s3 + $0x30] sm:$0xff]  }
  0x1e   : > { %v2881_v0 = vld [vmem:[%s543_s18] sm:$0xff]  ;;  %2396 = vmatprep.mubr.msk.bf16.mxu0 %vm2736_vm1, %v2735_v9  ;;  %2404 = vmatprep.mubr.msk.bf16.mxu1 %vm2736_vm1, %v2735_v9  ;;  %v2632_v29 = vld [vmem:[%s3263_s4 + $0x10] sm:$0xff]   ;;  %v2633_v30 = vld [vmem:[%s3263_s4 + $0x28] sm:$0xff]   ;;  %s2243_s18 = sshll.u32 %s537_s19, 3  ;;  %s2677_s23 = sshll.u32 %s2737_s21, 4  ;;  %s2678_s23 = int_to_ptr.vmem [resolvable:$false] %s2677_s23 }
  0x1f   : > { %v549_v1 = vsel %vm548_vm0, %v2881_v0, 0.0  ;;  %v2631_v28 = vld [vmem:[%s3263_s4] sm:$0xff]   ;;  %v2634_v31 = vld [vmem:[%s3263_s4 + $0x38] sm:$0xff]   ;;  %v2636_v33 = vld [vmem:[%s3263_s4 + $0x30] sm:$0xff]   ;;  %s539_s29 = scalar_lea.vmem [#allocation2], %s2243_s18 }
  0x20   : > { %550 = vadd.xlane.f32.xlu0 %v549_v1  ;;  %2395 = vmatpush3.bf16.msra.mxu0 %v2623_v10  ;;  %v2635_v32 = vld [vmem:[%s3263_s4 + $0x20] sm:$0xff]   ;;  %v2637_v34 = vld [vmem:[%s3264_s5 + $0x8] sm:$0xff]   ;;  %v2638_v35 = vld [vmem:[%s3264_s5 + $0x18] sm:$0xff]   ;;  %s2180_s26 = sshll.u32 %s539_s29, 4  ;;  %s3219_s26 = int_to_ptr.vmem [resolvable:$true] %s2180_s26 }
  0x21   : > { %2403 = vmatpush3.bf16.msra.mxu1 %v2624_v11  ;;  %2408 = vmatprep.subr.bf16.mxu0 %v2735_v9  ;;  %v2639_v36 = vld [vmem:[%s3264_s5] sm:$0xff]   ;;  %v2640_v37 = vld [vmem:[%s3264_s5 + $0x10] sm:$0xff]   ;;  %v2641_v38 = vld [vmem:[%s3264_s5 + $0x28] sm:$0xff]   ;;  %s2673_s18 = scalar_lea.vmem %s3219_s26, 128  ;;  %p2680_p0 = scmp.lt.s32.totalorder %s3219_s26, %s2678_s23 }
  0x22   : > { %2416 = vmatprep.subr.bf16.mxu1 %v2735_v9  ;;  %v2642_v39 = vld [vmem:[%s3264_s5 + $0x38] sm:$0xff]   ;;  %v2643_v40 = vld [vmem:[%s3264_s5 + $0x20] sm:$0xff]   ;;  %v2644_v41 = vld [vmem:[%s3264_s5 + $0x30] sm:$0xff]   ;;  %p2674_p11 = scmp.ne.s32.totalorder %s3219_s26, %s2673_s18 }
  0x23   : > { %v2245_v16 = vld [vmem:[%s3291_s22] ss:$0 sm:$0xff]  ;;  %v2264_v59 = vld [vmem:[%s3266_s7 + $0x1] ss:$0 sm:$0xff]  ;;  %s2321_s22 = sshll.u32 %s2849_s28, 7  ;;  %s2167_s28 = scalar_lea.sflag [#allocation3], %s537_s19 }
  0x24   : > { %v2263_v58 = vld [vmem:[%s3266_s7] ss:$0 sm:$0xff]  ;;  %v2248_v61 = vld [vmem:[%s3265_s6 + $0x1] ss:$0 sm:$0xff]  ;;  %s3217_s2 = scalar_lea.hbm %s3276_s17, %s2321_s22  ;;  %p2675_p12 = pnand %p2674_p11, %p2866_p5 }
  0x25   : > { %v2247_v60 = vld [vmem:[%s3265_s6] ss:$0 sm:$0xff]  ;;  %s2679_s22 = scalar_lea.vmem %s2678_s23, 256 }
  0x26   : > { %p2676_p13 = pneg %p2675_p12  ;;  %p2681_p1 = scmp.lt.s32.totalorder %s2679_s22, %s2673_s18 }
  0x28   : > { %p2682_p2 = por %p2681_p1, %p2680_p0 }
  0x2a   : > { %p2683_p3 = pnand %p2682_p2, %p2676_p13 }
  0xa9   : > { %v551_v2 = vpop.xlane.xlu0 %550 }
  0xaa   : > { %v553_v3 = vmul.f32 0.03125, %v551_v2 }
  0xac   : > { %v554_v4 = vsub.f32 %v2881_v0, %v553_v3 }
  0xae   : > { %v555_v5 = vmul.f32 %v554_v4, %v554_v4 }
  0xb0   : > { %v556_v6 = vsel %vm548_vm0, %v555_v5, 0.0 }
  0xb1   : > { %557 = vadd.xlane.f32.xlu0 %v556_v6 }
 0x13a   : > { %v558_v12 = vpop.xlane.xlu0 %557 }
 0x13b   : > { %v559_v13 = vmul.f32 0.03125, %v558_v12 }
 0x13d   : > { %v560_v14 = vadd.f32 1e-05, %v559_v13 }
 0x13f   : > { %2651 = vrsqrt.f32 %v560_v14  ;;  %v2265_v14 = vld [vmem:[%s3266_s7 + $0x2] ss:$0 sm:$0xff] }
 0x14c   : > { %v2652_v15 = vpop.eup %2651 }
 0x14d   : > { %v562_v17 = vmul.f32 %v2652_v15, %v554_v4 }
 0x14f   : > { %v569_v19 = vmul.f32 %v2245_v16, %v562_v17 }
 0x151   : > { %v576_v20 = vadd.f32 %v2246_v18, %v569_v19  ;;  %v2266_v19 = vld [vmem:[%s3266_s7 + $0x3] ss:$0 sm:$0xff] }
 0x153   : > { %v2921_v23 = vpack.c.bf16 %v576_v20, %v576_v20  ;;  %v2249_v20 = vld [vmem:[%s3265_s6 + $0x2] ss:$0 sm:$0xff] }
 0x155   : > { %2397 = vmatmul.mubr.msk.bf16.vlgmr.msra.gmra.mxu0 %vm548_vm0, %v2921_v23  ;;  %2405 = vmatmul.mubr.msk.bf16.vlgmr.msra.gmra.mxu1 %vm548_vm0, %v2921_v23 }
 0x156   : > { %2409 = vmatpush3.bf16.msra.mxu0 %v2625_v21  ;;  %2417 = vmatpush3.bf16.msra.mxu1 %v2626_v22  ;;  %v2250_v21 = vld [vmem:[%s3265_s6 + $0x3] ss:$0 sm:$0xff] }
 0x157   : > { %2410 = vmatprep.subr.bf16.mxu0 %v2735_v9  ;;  %2418 = vmatprep.subr.bf16.mxu1 %v2735_v9 }
 0x158   : > { %2412 = vmatprep.mubr.msk.bf16.mxu0 %vm2736_vm1, %v2735_v9  ;;  %2420 = vmatprep.mubr.msk.bf16.mxu1 %vm2736_vm1, %v2735_v9 }
 0x15a   : > { %2411 = vmatpush3.bf16.msra.mxu0 %v2627_v24  ;;  %2419 = vmatpush3.bf16.msra.mxu1 %v2628_v25 }
 0x15b   : > { %2424 = vmatprep.subr.bf16.mxu0 %v2735_v9  ;;  %2432 = vmatprep.subr.bf16.mxu1 %v2735_v9 }
 0x15d   : > { %2413 = vmatmul.mubr.msk.bf16.vlgmr.msra.gmra.mxu0 %vm548_vm0, %v2921_v23  ;;  %2421 = vmatmul.mubr.msk.bf16.vlgmr.msra.gmra.mxu1 %vm548_vm0, %v2921_v23 }
 0x15e   : > { %2425 = vmatpush3.bf16.msra.mxu0 %v2629_v26  ;;  %2433 = vmatpush3.bf16.msra.mxu1 %v2630_v27 }
 0x15f   : > { %2426 = vmatprep.subr.bf16.mxu0 %v2735_v9  ;;  %2434 = vmatprep.subr.bf16.mxu1 %v2735_v9 }
 0x160   : > { %2428 = vmatprep.mubr.msk.bf16.mxu0 %vm2736_vm1, %v2735_v9  ;;  %2436 = vmatprep.mubr.msk.bf16.mxu1 %vm2736_vm1, %v2735_v9 }
 0x162   : > { %2427 = vmatpush3.bf16.msra.mxu0 %v2631_v28  ;;  %2435 = vmatpush3.bf16.msra.mxu1 %v2632_v29 }
 0x163   : > { %2440 = vmatprep.subr.bf16.mxu0 %v2735_v9  ;;  %2448 = vmatprep.subr.bf16.mxu1 %v2735_v9 }
 0x165   : > { %2429 = vmatmul.mubr.msk.bf16.vlgmr.msra.gmra.mxu0 %vm548_vm0, %v2921_v23  ;;  %2437 = vmatmul.mubr.msk.bf16.vlgmr.msra.gmra.mxu1 %vm548_vm0, %v2921_v23 }
 0x166   : > { %2441 = vmatpush3.bf16.msra.mxu0 %v2633_v30  ;;  %2449 = vmatpush3.bf16.msra.mxu1 %v2634_v31 }
 0x167   : > { %2442 = vmatprep.subr.bf16.mxu0 %v2735_v9  ;;  %2450 = vmatprep.subr.bf16.mxu1 %v2735_v9 }
 0x168   : > { %2444 = vmatprep.mubr.msk.bf16.mxu0 %vm2736_vm1, %v2735_v9  ;;  %2452 = vmatprep.mubr.msk.bf16.mxu1 %vm2736_vm1, %v2735_v9 }
 0x16a   : > { %2443 = vmatpush3.bf16.msra.mxu0 %v2635_v32  ;;  %2451 = vmatpush3.bf16.msra.mxu1 %v2636_v33 }
 0x16b   : > { %2456 = vmatprep.subr.bf16.mxu0 %v2735_v9  ;;  %2464 = vmatprep.subr.bf16.mxu1 %v2735_v9 }
 0x16d   : > { %2445 = vmatmul.mubr.msk.bf16.vlgmr.msra.gmra.mxu0 %vm548_vm0, %v2921_v23  ;;  %2453 = vmatmul.mubr.msk.bf16.vlgmr.msra.gmra.mxu1 %vm548_vm0, %v2921_v23 }
 0x16e   : > { %2457 = vmatpush3.bf16.msra.mxu0 %v2637_v34  ;;  %2465 = vmatpush3.bf16.msra.mxu1 %v2638_v35 }
 0x16f   : > { %2458 = vmatprep.subr.bf16.mxu0 %v2735_v9  ;;  %2466 = vmatprep.subr.bf16.mxu1 %v2735_v9 }
 0x170   : > { %2460 = vmatprep.mubr.msk.bf16.mxu0 %vm2736_vm1, %v2735_v9  ;;  %2468 = vmatprep.mubr.msk.bf16.mxu1 %vm2736_vm1, %v2735_v9 }
 0x172   : > { %2459 = vmatpush3.bf16.msra.mxu0 %v2639_v36  ;;  %2467 = vmatpush3.bf16.msra.mxu1 %v2640_v37 }
 0x173   : > { %2472 = vmatprep.subr.bf16.mxu0 %v2735_v9  ;;  %2480 = vmatprep.subr.bf16.mxu1 %v2735_v9 }
 0x175   : > { %2461 = vmatmul.mubr.msk.bf16.vlgmr.msra.gmra.mxu0 %vm548_vm0, %v2921_v23  ;;  %2469 = vmatmul.mubr.msk.bf16.vlgmr.msra.gmra.mxu1 %vm548_vm0, %v2921_v23 }
 0x176   : > { %2473 = vmatpush3.bf16.msra.mxu0 %v2641_v38  ;;  %2481 = vmatpush3.bf16.msra.mxu1 %v2642_v39 }
 0x177   : > { %2474 = vmatprep.subr.bf16.mxu0 %v2735_v9  ;;  %2482 = vmatprep.subr.bf16.mxu1 %v2735_v9 }
 0x178   : > { %2476 = vmatprep.mubr.msk.bf16.mxu0 %vm2736_vm1, %v2735_v9  ;;  %2484 = vmatprep.mubr.msk.bf16.mxu1 %vm2736_vm1, %v2735_v9 }
 0x17a   : > { %2475 = vmatpush3.bf16.msra.mxu0 %v2643_v40  ;;  %2483 = vmatpush3.bf16.msra.mxu1 %v2644_v41  ;;  %v2279_v40 = vld [vmem:[%s3267_s8] ss:$0 sm:$0xff]  ;;  %v2280_v41 = vld [vmem:[%s3267_s8 + $0x1] ss:$0 sm:$0xff] }
 0x17b   : > { %2488 = vmatprep.subr.bf16.mxu0 %v2735_v9  ;;  %2494 = vmatprep.subr.bf16.mxu1 %v2735_v9 }
 0x17d   : > { %2477 = vmatmul.mubr.msk.bf16.vlgmr.msra.gmra.mxu0 %vm548_vm0, %v2921_v23  ;;  %2485 = vmatmul.mubr.msk.bf16.vlgmr.msra.gmra.mxu1 %vm548_vm0, %v2921_v23 }
 0x17e   : > { %2490 = vmatprep.mubr.msk.bf16.mxu0 %vm2736_vm1, %v2735_v9  ;;  %2496 = vmatprep.mubr.msk.bf16.mxu1 %vm2736_vm1, %v2735_v9 }
 0x215   : > { %v703_v42 = vpop.f32.mrf.mxu0  ;;  %v755_v43 = vpop.f32.mrf.mxu1 }
 0x216   : > { %v704_v3 = vadd.f32 %v2247_v60, %v703_v42  ;;  %v756_v4 = vadd.f32 %v2248_v61, %v755_v43 }
 0x217   : > { %v2398_v44 = vpop.f32.mrf.mxu0  ;;  %v2406_v45 = vpop.f32.mrf.mxu1 }
 0x218   : > { %v865_v15 = vmul.f32 0.35355338, %v704_v3  ;;  %v866_v16 = vmul.f32 0.35355338, %v756_v4 }
 0x219   : > { %v706_v46 = vpop.f32.mrf.mxu0  ;;  %v758_v47 = vpop.f32.mrf.mxu1 }
 0x21a   : > { %v1341_v26 = vpack.c.bf16 %v865_v15, %v865_v15  ;;  %v1342_v27 = vpack.c.bf16 %v866_v16, %v866_v16 }
 0x21b   : > { %v2399_v48 = vpop.f32.mrf.mxu0  ;;  %v2407_v49 = vpop.f32.mrf.mxu1 }
 0x21d   : > { %v807_v50 = vpop.f32.mrf.mxu0  ;;  %v859_v51 = vpop.f32.mrf.mxu1 }
 0x21e   : > { %v808_v30 = vadd.f32 %v2249_v20, %v807_v50  ;;  %v860_v31 = vadd.f32 %v2250_v21, %v859_v51 }
 0x21f   : > { %v2414_v52 = vpop.f32.mrf.mxu0  ;;  %v2422_v53 = vpop.f32.mrf.mxu1 }
 0x220   : > { %v867_v42 = vmul.f32 0.35355338, %v808_v30  ;;  %v868_v43 = vmul.f32 0.35355338, %v860_v31 }
 0x221   : > { %v810_v54 = vpop.f32.mrf.mxu0  ;;  %v862_v55 = vpop.f32.mrf.mxu1 }
 0x222   : > { %v1343_v50 = vpack.c.bf16 %v867_v42, %v867_v42  ;;  %v1344_v51 = vpack.c.bf16 %v868_v43, %v868_v43 }
 0x223   : > { %v2415_v56 = vpop.f32.mrf.mxu0  ;;  %v2423_v57 = vpop.f32.mrf.mxu1 }
 0x225   : > { %v943_v62 = vpop.f32.mrf.mxu0  ;;  %v995_v63 = vpop.f32.mrf.mxu1 }
 0x226   : > { %v944_v1 = vadd.f32 %v2263_v58, %v943_v62  ;;  %v996_v2 = vadd.f32 %v2264_v59, %v995_v63 }
 0x227   : > { %v2430_v5 = vpop.f32.mrf.mxu0  ;;  %v2438_v6 = vpop.f32.mrf.mxu1 }
 0x228   : > { %v1345_v7 = vpack.c.bf16 %v944_v1, %v944_v1  ;;  %v1346_v8 = vpack.c.bf16 %v996_v2, %v996_v2 }
 0x229   : > { %v946_v10 = vpop.f32.mrf.mxu0  ;;  %v998_v11 = vpop.f32.mrf.mxu1 }
 0x22a   : > { %v1354_v12 = vsel %vm1349_vm2, %v1345_v7, 0  ;;  %v1400_v13 = vsel %vm1349_vm2, %v1346_v8, 0 }
 0x22b   : > { %v2431_v17 = vpop.f32.mrf.mxu0  ;;  %v2439_v18 = vpop.f32.mrf.mxu1  ;;  %2489 = vmatpush3.bf16.xpose.msra.mxu0 %v1354_v12  ;;  %2495 = vmatpush3.bf16.xpose.msra.mxu1 %v1400_v13 }
 0x22c   : > { %2500 = vmatprep.subr.bf16.mxu0 %v2735_v9  ;;  %2506 = vmatprep.subr.bf16.mxu1 %v2735_v9 }
 0x22d   : > { %v1047_v22 = vpop.f32.mrf.mxu0  ;;  %v1099_v23 = vpop.f32.mrf.mxu1 }
 0x22e   : > { %v1048_v24 = vadd.f32 %v2265_v14, %v1047_v22  ;;  %v1100_v25 = vadd.f32 %v2266_v19, %v1099_v23 }
 0x22f   : > { %v2446_v28 = vpop.f32.mrf.mxu0  ;;  %v2454_v29 = vpop.f32.mrf.mxu1 }
 0x230   : > { %v1347_v32 = vpack.c.bf16 %v1048_v24, %v1048_v24  ;;  %v1348_v33 = vpack.c.bf16 %v1100_v25, %v1100_v25 }
 0x231   : > { %v1050_v34 = vpop.f32.mrf.mxu0  ;;  %v1102_v35 = vpop.f32.mrf.mxu1 }
 0x232   : > { %v1446_v36 = vsel %vm1349_vm2, %v1347_v32, 0  ;;  %v1492_v37 = vsel %vm1349_vm2, %v1348_v33, 0  ;;  %2491 = vmatmul.mubr.msk.bf16.vlgmr.msra.gmra.mxu0 %vm1349_vm2, %v1341_v26  ;;  %2497 = vmatmul.mubr.msk.bf16.vlgmr.msra.gmra.mxu1 %vm1349_vm2, %v1342_v27 }
 0x233   : > { %v2447_v38 = vpop.f32.mrf.mxu0  ;;  %v2455_v39 = vpop.f32.mrf.mxu1  ;;  %2501 = vmatpush3.bf16.xpose.msra.mxu0 %v1446_v36  ;;  %2507 = vmatpush3.bf16.xpose.msra.mxu1 %v1492_v37 }
 0x234   : > { %2502 = vmatprep.mubr.msk.bf16.mxu0 %vm2736_vm1, %v2735_v9  ;;  %2508 = vmatprep.mubr.msk.bf16.mxu1 %vm2736_vm1, %v2735_v9 }
 0x235   : > { %v1179_v44 = vpop.f32.mrf.mxu0  ;;  %v1231_v45 = vpop.f32.mrf.mxu1  ;;  %2512 = vmatprep.subr.bf16.mxu0 %v2735_v9  ;;  %2518 = vmatprep.subr.bf16.mxu1 %v2735_v9 }
 0x236   : > { %v1180_v46 = vadd.f32 %v2279_v40, %v1179_v44  ;;  %v1232_v47 = vadd.f32 %v2280_v41, %v1231_v45 }
 0x237   : > { %v2462_v48 = vpop.f32.mrf.mxu0  ;;  %v2470_v49 = vpop.f32.mrf.mxu1 }
 0x238   : > { %v1582_v52 = vpack.c.bf16 %v1180_v46, %v1180_v46  ;;  %v1583_v53 = vpack.c.bf16 %v1232_v47, %v1232_v47  ;;  %v2281_v48 = vld [vmem:[%s3267_s8 + $0x2] ss:$0 sm:$0xff] }
 0x239   : > { %v1182_v54 = vpop.f32.mrf.mxu0  ;;  %v1234_v55 = vpop.f32.mrf.mxu1 }
 0x23a   : > { %v1591_v56 = vsel %vm1589_vm3, %v1582_v52, 0  ;;  %v1637_v57 = vsel %vm1589_vm3, %v1583_v53, 0  ;;  %2503 = vmatmul.mubr.msk.bf16.vlgmr.msra.gmra.mxu0 %vm1349_vm2, %v1343_v50  ;;  %2509 = vmatmul.mubr.msk.bf16.vlgmr.msra.gmra.mxu1 %vm1349_vm2, %v1344_v51  ;;  %v2282_v52 = vld [vmem:[%s3267_s8 + $0x3] ss:$0 sm:$0xff] }
 0x23b   : > { %v2463_v58 = vpop.f32.mrf.mxu0  ;;  %v2471_v59 = vpop.f32.mrf.mxu1  ;;  %2513 = vmatpush3.bf16.msra.mxu0 %v1591_v56  ;;  %2519 = vmatpush3.bf16.msra.mxu1 %v1637_v57 }
 0x23c   : > { %2514 = vmatprep.mubr.msk.bf16.mxu0 %vm2736_vm1, %v2735_v9  ;;  %2524 = vmatprep.subr.bf16.mxu0 %v2735_v9 }
 0x23d   : > { %v3096_v60 = vpop.f32.mrf.mxu0  ;;  %v3098_v61 = vpop.f32.mrf.mxu1  ;;  %2520 = vmatprep.mubr.msk.bf16.mxu1 %vm2736_vm1, %v2735_v9  ;;  %2530 = vmatprep.subr.bf16.mxu1 %v2735_v9 }
 0x23e   : > { %v1284_v51 = vadd.f32 %v2281_v48, %v3096_v60  ;;  %v1336_v55 = vadd.f32 %v2282_v52, %v3098_v61 }
 0x23f   : > { %v2478_v62 = vpop.f32.mrf.mxu0  ;;  %v2486_v63 = vpop.f32.mrf.mxu1 }
 0x240   : > { %v1584_v54 = vpack.c.bf16 %v1284_v51, %v1284_v51  ;;  %v1585_v62 = vpack.c.bf16 %v1336_v55, %v1336_v55 }
 0x241   : > { %v1286_v1 = vpop.f32.mrf.mxu0  ;;  %v1338_v2 = vpop.f32.mrf.mxu1 }
 0x242   : > { %v1683_v59 = vsel %vm1589_vm3, %v1584_v54, 0  ;;  %v1729_v61 = vsel %vm1589_vm3, %v1585_v62, 0  ;;  %v2307_v54 = vld [vmem:[%s3269_s10] ss:$0 sm:$0xff] }
 0x243   : > { %v2479_v3 = vpop.f32.mrf.mxu0  ;;  %v2487_v4 = vpop.f32.mrf.mxu1 }
 0x244   : > { %v1775_v3 = vld [vmem:[%s3268_s9] sm:$0xf] }
 0x2f2   : > { %v1390_v5 = vpop.f32.mrf.mxu0  ;;  %v1436_v6 = vpop.f32.mrf.mxu1 }
 0x2f3   : > { %v1534_v7 = vsel %vm1349_vm2, %v1390_v5, -inf  ;;  %v1537_v13 = vsel %vm1349_vm2, %v1436_v6, -inf }
 0x2f4   : > { %v2498_v8 = vpop.f32.mrf.mxu1  ;;  %1535 = vmax.xlane.f32.xlu1 %v1534_v7  ;;  %v2492_v10 = vpop.f32.mrf.mxu0  ;;  %v1783_v7 = vsel %vm1589_vm3, %v1775_v3, 0 }
 0x2f5   : > { %v1776_v10 = vld [vmem:[%s3268_s9 + $0x4] sm:$0xf] }
 0x2f6   : > { %v1393_v11 = vpop.f32.mrf.mxu0  ;;  %v1439_v12 = vpop.f32.mrf.mxu1 }
 0x2f7   : > { %v1829_v11 = vsel %vm1589_vm3, %v1776_v10, 0  ;;  %v1777_v12 = vld [vmem:[%s3268_s9 + $0x8] sm:$0xf] }
 0x2f8   : > { %v2499_v14 = vpop.f32.mrf.mxu1  ;;  %1538 = vmax.xlane.f32.xlu1 %v1537_v13  ;;  %v2493_v15 = vpop.f32.mrf.mxu0 }
 0x2f9   : > { %v1875_v15 = vsel %vm1589_vm3, %v1777_v12, 0 }
 0x2fa   : > { %v1482_v16 = vpop.f32.mrf.mxu0  ;;  %v1528_v17 = vpop.f32.mrf.mxu1 }
 0x2fb   : > { %v1543_v18 = vsel %vm1349_vm2, %v1528_v17, -inf  ;;  %v1540_v19 = vsel %vm1349_vm2, %v1482_v16, -inf }
 0x2fc   : > { %v2510_v20 = vpop.f32.mrf.mxu1  ;;  %1544 = vmax.xlane.f32.xlu1 %v1543_v18  ;;  %1541 = vmax.xlane.f32.xlu0 %v1540_v19  ;;  %v2504_v21 = vpop.f32.mrf.mxu0 }
 0x2fe   : > { %v1485_v22 = vpop.f32.mrf.mxu0  ;;  %v1531_v23 = vpop.f32.mrf.mxu1 }
 0x300   : > { %v2505_v24 = vpop.f32.mrf.mxu0  ;;  %v2511_v25 = vpop.f32.mrf.mxu1 }
 0x37d   : > { %v1536_v26 = vpop.xlane.xlu1 %1535 }
 0x37e   : > { %v1546_v27 = vsub.f32 %v1390_v5, %v1536_v26 }
 0x380   : > { %v1550_v28 = vmul.f32 1.442695, %v1546_v27 }
 0x381   : > { %v1539_v29 = vpop.xlane.xlu1 %1538 }
 0x382   : > { %2653 = vpow2.f32 %v1550_v28  ;;  %v1547_v30 = vsub.f32 %v1436_v6, %v1539_v29 }
 0x384   : > { %v1552_v31 = vmul.f32 1.442695, %v1547_v30 }
 0x385   : > { %v1545_v32 = vpop.xlane.xlu1 %1544  ;;  %v1542_v33 = vpop.xlane.xlu0 %1541 }
 0x386   : > { %2655 = vpow2.f32 %v1552_v31  ;;  %v1549_v34 = vsub.f32 %v1528_v17, %v1545_v32  ;;  %v1548_v35 = vsub.f32 %v1482_v16, %v1542_v33  ;;  %v1778_v17 = vld [vmem:[%s3268_s9 + $0xc] sm:$0xf] }
 0x387   : > { %v1921_v21 = vsel %vm1589_vm3, %v1778_v17, 0  ;;  %v2647_v17 = vld [vmem:[%s3274_s15 + $0x18] sm:$0xff]  }
 0x388   : > { %v1556_v36 = vmul.f32 1.442695, %v1549_v34  ;;  %v1554_v37 = vmul.f32 1.442695, %v1548_v35 }
 0x38a   : > { %2657 = vpow2.f32 %v1556_v36 }
 0x38b   : > { %2659 = vpow2.f32 %v1554_v37 }
 0x38f   : > { %v2654_v38 = vpop.eup %2653 }
 0x390   : > { %v1558_v39 = vsel %vm1349_vm2, %v2654_v38, 0.0 }
 0x391   : > { %1559 = vadd.xlane.f32.xlu0 %v1558_v39 }
 0x393   : > { %v2656_v40 = vpop.eup %2655 }
 0x394   : > { %v1561_v41 = vsel %vm1349_vm2, %v2656_v40, 0.0 }
 0x395   : > { %1562 = vadd.xlane.f32.xlu1 %v1561_v41 }
 0x397   : > { %v2658_v42 = vpop.eup %2657 }
 0x398   : > { %v2660_v43 = vpop.eup %2659  ;;  %v1567_v44 = vsel %vm1349_vm2, %v2658_v42, 0.0 }
 0x399   : > { %1568 = vadd.xlane.f32.xlu1 %v1567_v44  ;;  %v1564_v45 = vsel %vm1349_vm2, %v2660_v43, 0.0 }
 0x39a   : > { %1565 = vadd.xlane.f32.xlu0 %v1564_v45 }
 0x41a   : > { %v1560_v46 = vpop.xlane.xlu0 %1559 }
 0x41b   : > { %2661 = vrcp.f32 %v1560_v46 }
 0x41e   : > { %v1563_v47 = vpop.xlane.xlu1 %1562 }
 0x41f   : > { %2663 = vrcp.f32 %v1563_v47 }
 0x422   : > { %v1569_v49 = vpop.xlane.xlu1 %1568 }
 0x423   : > { %2665 = vrcp.f32 %v1569_v49  ;;  %v1566_v50 = vpop.xlane.xlu0 %1565 }
 0x424   : > { %2667 = vrcp.f32 %v1566_v50 }
 0x428   : > { %v2662_v53 = vpop.eup %2661 }
 0x429   : > { %v1574_v56 = vmul.f32 %v2662_v53, %v2654_v38 }
 0x42b   : > { %v1578_v57 = vpack.c.bf16 %v1574_v56, %v1574_v56 }
 0x42c   : > { %v2664_v58 = vpop.eup %2663 }
 0x42d   : > { %2515 = vmatmul.mubr.msk.bf16.vlgmr.msra.gmra.mxu0 %vm1349_vm2, %v1578_v57  ;;  %v1575_v63 = vmul.f32 %v2664_v58, %v2656_v40 }
 0x42e   : > { %2525 = vmatpush3.bf16.msra.mxu0 %v1683_v59  ;;  %2526 = vmatprep.mubr.msk.bf16.mxu0 %vm2736_vm1, %v2735_v9 }
 0x42f   : > { %v1579_v60 = vpack.c.bf16 %v1575_v63, %v1575_v63  ;;  %2536 = vmatprep.subr.bf16.mxu0 %v2735_v9 }
 0x430   : > { %v2666_v1 = vpop.eup %2665 }
 0x431   : > { %v2668_v2 = vpop.eup %2667  ;;  %2521 = vmatmul.mubr.msk.bf16.vlgmr.msra.gmra.mxu1 %vm1349_vm2, %v1579_v60  ;;  %v1577_v5 = vmul.f32 %v2666_v1, %v2658_v42 }
 0x432   : > { %2531 = vmatpush3.bf16.msra.mxu1 %v1729_v61  ;;  %v1576_v4 = vmul.f32 %v2668_v2, %v2660_v43  ;;  %2532 = vmatprep.mubr.msk.bf16.mxu1 %vm2736_vm1, %v2735_v9 }
 0x433   : > { %2542 = vmatprep.subr.bf16.mxu1 %v2735_v9  ;;  %v1581_v8 = vpack.c.bf16 %v1577_v5, %v1577_v5  ;;  %v2645_v5 = vld [vmem:[%s3272_s13 + $0x8] sm:$0xff]  }
 0x434   : > { %v1580_v6 = vpack.c.bf16 %v1576_v4, %v1576_v4 }
 0x436   : > { %2527 = vmatmul.mubr.msk.bf16.vlgmr.msra.gmra.mxu0 %vm1349_vm2, %v1580_v6  ;;  %v2646_v6 = vld [vmem:[%s3272_s13] sm:$0xff]  }
 0x437   : > { %2537 = vmatpush3.bf16.msra.mxu0 %v1783_v7  ;;  %2538 = vmatprep.mubr.msk.bf16.mxu0 %vm2736_vm1, %v2735_v9 }
 0x438   : > { %2548 = vmatprep.subr.bf16.mxu0 %v2735_v9 }
 0x439   : > { %2533 = vmatmul.mubr.msk.bf16.vlgmr.msra.gmra.mxu1 %vm1349_vm2, %v1581_v8 }
 0x43a   : > { %2544 = vmatprep.mubr.msk.bf16.mxu1 %vm2736_vm1, %v2735_v9  ;;  %2543 = vmatpush3.bf16.msra.mxu1 %v1829_v11  ;;  %v2308_v11 = vld [vmem:[%s3270_s11] ss:$0 sm:$0xff] }
 0x43b   : > { %2554 = vmatprep.subr.bf16.mxu1 %v2735_v9 }
 0x4ed   : > { %v1627_v13 = vpop.f32.mrf.mxu0 }
 0x4ee   : > { %v1771_v14 = vpack.c.bf16 %v1627_v13, %v1627_v13  ;;  %v2309_v13 = vld [vmem:[%s3271_s12] ss:$0 sm:$0xff] }
 0x4ef   : > { %v2516_v16 = vpop.f32.mrf.mxu0 }
 0x4f0   : > { %2539 = vmatmul.mubr.msk.bf16.vlgmr.msra.gmra.mxu0 %vm1349_vm2, %v1771_v14 }
 0x4f1   : > { %v1630_v18 = vpop.f32.mrf.mxu0  ;;  %v1673_v19 = vpop.f32.mrf.mxu1  ;;  %2549 = vmatpush3.bf16.msra.mxu0 %v1875_v15  ;;  %2550 = vmatprep.mubr.msk.bf16.mxu0 %vm2736_vm1, %v2735_v9 }
 0x4f2   : > { %v1772_v20 = vpack.c.bf16 %v1673_v19, %v1673_v19  ;;  %2560 = vmatprep.subr.bf16.mxu0 %v2735_v9  ;;  %v2648_v18 = vld [vmem:[%s3274_s15 + $0x10] sm:$0xff]   ;;  %v2649_v19 = vld [vmem:[%s3274_s15 + $0x8] sm:$0xff]  }
 0x4f3   : > { %v2517_v22 = vpop.f32.mrf.mxu0  ;;  %v2522_v23 = vpop.f32.mrf.mxu1 }
 0x4f4   : > { %2545 = vmatmul.mubr.msk.bf16.vlgmr.msra.gmra.mxu1 %vm1349_vm2, %v1772_v20  ;;  %v2650_v20 = vld [vmem:[%s3274_s15] sm:$0xff]  }
 0x4f5   : > { %v1676_v24 = vpop.f32.mrf.mxu1  ;;  %2555 = vmatpush3.bf16.msra.mxu1 %v1921_v21  ;;  %2556 = vmatprep.mubr.msk.bf16.mxu1 %vm2736_vm1, %v2735_v9  ;;  %v2310_v21 = vld [vmem:[%s3273_s14] ss:$0 sm:$0xff] }
 0x4f6   : > { %v1719_v25 = vpop.f32.mrf.mxu0  ;;  %2568 = vmatprep.subr.bf16.mxu1 %v2735_v9 }
 0x4f7   : > { %v1773_v26 = vpack.c.bf16 %v1719_v25, %v1719_v25  ;;  %v2523_v27 = vpop.f32.mrf.mxu1 }
 0x4f8   : > { %v2528_v28 = vpop.f32.mrf.mxu0 }
 0x4f9   : > { %2551 = vmatmul.mubr.msk.bf16.vlgmr.msra.gmra.mxu0 %vm1349_vm2, %v1773_v26  ;;  %v1765_v29 = vpop.f32.mrf.mxu1 }
 0x4fa   : > { %v1722_v30 = vpop.f32.mrf.mxu0  ;;  %v1774_v31 = vpack.c.bf16 %v1765_v29, %v1765_v29  ;;  %2564 = vmatprep.mubr.msk.bf16.mxu0 %vm2736_vm1, %v2735_v9  ;;  %2561 = vmatpush3.bf16.msra.mxu0 %v2645_v5 }
 0x4fb   : > { %v2534_v32 = vpop.f32.mrf.mxu1  ;;  %2562 = vmatprep.subr.bf16.mxu0 %v2735_v9 }
 0x4fc   : > { %v2529_v33 = vpop.f32.mrf.mxu0  ;;  %2557 = vmatmul.mubr.msk.bf16.vlgmr.msra.gmra.mxu1 %vm1349_vm2, %v1774_v31  ;;  %v2314_v32 = vld [vmem:[%s3275_s16] ss:$0 sm:$0xff] }
 0x4fd   : > { %v1768_v34 = vpop.f32.mrf.mxu1  ;;  %2576 = vmatprep.mubr.msk.bf16.mxu1 %vm2736_vm1, %v2735_v9  ;;  %2569 = vmatpush3.bf16.msra.mxu1 %v2647_v17 }
 0x4fe   : > { %2563 = vmatpush3.bf16.msra.mxu0 %v2646_v6  ;;  %2570 = vmatprep.subr.bf16.mxu1 %v2735_v9 }
 0x4ff   : > { %v2535_v35 = vpop.f32.mrf.mxu1 }
 0x501   : > { %2571 = vmatpush3.bf16.msra.mxu1 %v2648_v18 }
 0x502   : > { %2572 = vmatprep.subr.bf16.mxu1 %v2735_v9 }
 0x505   : > { %2573 = vmatpush3.bf16.msra.mxu1 %v2649_v19 }
 0x506   : > { %2574 = vmatprep.subr.bf16.mxu1 %v2735_v9 }
 0x509   : > { %2575 = vmatpush3.bf16.msra.mxu1 %v2650_v20 }
 0x5b0   : > { %v1819_v36 = vpop.f32.mrf.mxu0 }
 0x5b1   : > { %v1963_v44 = vsel %vm548_vm0, %v1819_v36, 0.0 }
 0x5b2   : > { %v2540_v37 = vpop.f32.mrf.mxu0 }
 0x5b4   : > { %v1822_v38 = vpop.f32.mrf.mxu0  ;;  %v1865_v39 = vpop.f32.mrf.mxu1 }
 0x5b5   : > { %v1964_v42 = vsel %vm548_vm0, %v1865_v39, 0.0 }
 0x5b6   : > { %v2541_v40 = vpop.f32.mrf.mxu0  ;;  %v2546_v41 = vpop.f32.mrf.mxu1  ;;  %v1965_v46 = vadd.f32 %v1964_v42, %v1963_v44 }
 0x5b8   : > { %v1868_v43 = vpop.f32.mrf.mxu1 }
 0x5b9   : > { %v1911_v45 = vpop.f32.mrf.mxu0 }
 0x5ba   : > { %v1966_v47 = vsel %vm548_vm0, %v1911_v45, 0.0  ;;  %v2547_v48 = vpop.f32.mrf.mxu1 }
 0x5bb   : > { %v2552_v49 = vpop.f32.mrf.mxu0  ;;  %v1967_v50 = vadd.f32 %v1966_v47, %v1965_v46 }
 0x5bc   : > { %v1957_v51 = vpop.f32.mrf.mxu1 }
 0x5bd   : > { %v1914_v52 = vpop.f32.mrf.mxu0  ;;  %v1968_v53 = vsel %vm548_vm0, %v1957_v51, 0.0 }
 0x5be   : > { %v1969_v55 = vadd.f32 %v1968_v53, %v1967_v50  ;;  %v2558_v56 = vpop.f32.mrf.mxu1 }
 0x5bf   : > { %v2553_v57 = vpop.f32.mrf.mxu0 }
 0x5c0   : > { %v1977_v58 = vadd.f32 %v2307_v54, %v1969_v55  ;;  %v1960_v59 = vpop.f32.mrf.mxu1 }
 0x5c2   : > { %v2559_v62 = vpop.f32.mrf.mxu1  ;;  %v1978_v63 = vadd.f32 %v1977_v58, %v2881_v0 }
 0x5c4   : > { %v1981_v60 = vsel %vm548_vm0, %v1978_v63, 0.0 }
 0x5c5   : > { %1982 = vadd.xlane.f32.xlu0 %v1981_v60 }
 0x64e   : > { %v1983_v1 = vpop.xlane.xlu0 %1982 }
 0x64f   : > { %v1984_v2 = vmul.f32 0.03125, %v1983_v1 }
 0x651   : > { %v1985_v61 = vsub.f32 %v1978_v63, %v1984_v2 }
 0x653   : > { %v1986_v3 = vmul.f32 %v1985_v61, %v1985_v61 }
 0x655   : > { %v1987_v4 = vsel %vm548_vm0, %v1986_v3, 0.0 }
 0x656   : > { %1988 = vadd.xlane.f32.xlu1 %v1987_v4 }
 0x6df   : > { %v1989_v0 = vpop.xlane.xlu1 %1988 }
 0x6e0   : > { %v1990_v7 = vmul.f32 0.03125, %v1989_v0 }
 0x6e2   : > { %v1991_v8 = vadd.f32 1e-05, %v1990_v7 }
 0x6e4   : > { %2669 = vrsqrt.f32 %v1991_v8 }
 0x6f1   : > { %v2670_v10 = vpop.eup %2669 }
 0x6f2   : > { %v1993_v12 = vmul.f32 %v2670_v10, %v1985_v61 }
 0x6f4   : > { %v2000_v14 = vmul.f32 %v2308_v11, %v1993_v12 }
 0x6f6   : > { %v2007_v15 = vadd.f32 %v2309_v13, %v2000_v14 }
 0x6f8   : > { %v2008_v16 = vpack.c.bf16 %v2007_v15, %v2007_v15 }
 0x6fa   : > { %2565 = vmatmul.mubr.msk.bf16.vlgmr.msra.gmra.mxu0 %vm548_vm0, %v2008_v16 }
 0x7ba   : > { %v2069_v22 = vpop.f32.mrf.mxu0 }
 0x7bb   : > { %v2070_v23 = vadd.f32 %v2310_v21, %v2069_v22 }
 0x7bc   : > { %v2566_v24 = vpop.f32.mrf.mxu0 }
 0x7bd   : > { %v2076_v25 = vmul.f32 0.70710677, %v2070_v23  ;;  %v2075_v9 = vmul.f32 0.5, %v2070_v23 }
 0x7be   : > { %v2072_v26 = vpop.f32.mrf.mxu0 }
 0x7bf   : > { %2671 = verf.f32 %v2076_v25 }
 0x7c0   : > { %v2567_v27 = vpop.f32.mrf.mxu0 }
 0x7cc   : > { %v2672_v28 = vpop.eup %2671 }
 0x7cd   : > { %v2078_v29 = vadd.f32 1.0, %v2672_v28 }
 0x7cf   : > { %v2079_v30 = vmul.f32 %v2078_v29, %v2075_v9 }
 0x7d1   : > { %v2080_v31 = vpack.c.bf16 %v2079_v30, %v2079_v30 }
 0x7d3   : > { %2577 = vmatmul.mubr.msk.bf16.vlgmr.msra.gmra.mxu1 %vm2120_vm4, %v2080_v31 }
 0x893   : > { %v2158_v33 = vpop.f32.mrf.mxu1 }
 0x894   : > { %v2159_v34 = vadd.f32 %v2314_v32, %v2158_v33 }
 0x895   : > { %v2578_v35 = vpop.f32.mrf.mxu1 }
 0x896   : > { %v2164_v36 = vadd.f32 %v2159_v34, %v1978_v63 }
 0x897   : > { %v2161_v37 = vpop.f32.mrf.mxu1 }
 0x898   : > { %2165 = vst.msk [vmem:[%s539_s29] sm:$0xff] %vm548_vm0, %v2164_v36 }
 0x899   : > { %v2579_v38 = vpop.f32.mrf.mxu1 }
 0x89a   : > { %2686 = shalt.err (!%p2683_p3)
}
 0x89b   : > { %s2687_s29 = scalar_lea.hbm %s3217_s2, 128  ;;  %s2691_s30 = scalar_lea.hbm %s3276_s17, 256 }
 0x89c   : > { %p2688_p4 = scmp.ne.s32.totalorder %s3217_s2, %s2687_s29  ;;  %p2692_p9 = scmp.lt.s32.totalorder %s3217_s2, %s3276_s17 }
 0x89d   : > { %p2693_p10 = scmp.lt.s32.totalorder %s2691_s30, %s2687_s29 }
 0x89e   : > { %p2689_p7 = pnand %p2688_p4, %p2866_p5 }
 0x89f   : > { %p2694_p11 = por %p2693_p10, %p2692_p9 }
 0x8a0   : > { %p2690_p8 = pneg %p2689_p7 }
 0x8a2   : > { %p2695_p12 = pnand %p2694_p11, %p2690_p8 }
 0x8a4   : > { %2698 = shalt.err (!%p2695_p12)
}
 0x8a5   : > { %2580 = dma.vmem_to_hbm [thread:$0]  (%p2866_p5), %s3219_s26, 128, %s3217_s2, %s2167_s28  }
 0x8a6 PF: > { %p2586_p13 = scmp.ge.s32.totalorder %s2733_s27, 2  ;;  %s2192_s18 = sand.u32 1, %s2721_s24  }
 0x8a7   : > { %s2193_s3 = scalar_lea.sflag [#allocation3], %s2192_s18 }
 0x8a8   : > { %p2583_p0 = pnand %p2586_p13, %p2870_p6 }
 0x8aa   : > { %p2584_p1 = pneg %p2583_p0 }
 0x8ac   : > { %2716 = dma.done.wait (%p2584_p1), %s2193_s3, 128  }
 0x8ad   : > { %2718 = vsyncadd (%p2584_p1), %s2193_s3, 4294967168  ;;  %s3293_s27 = sld [smem:[#allocation6_spill]]  ;;  %s3296_s24 = smov %s2725_s25 }
 0x8ae   : > { %s3294_s23 = sld [smem:[#allocation5_spill]] }
 0x8af   : > { %s3295_s26 = sld [smem:[#allocation7_spill]] }
 0x8b3   : > { %p27_p2 = scmp.ge.s32.totalorder %s3293_s27, 4  }
 0x8b4   : > { %s3297_s25 = smov %s3294_s23 }
 0x8b5   :  { %29 = sbr.rel (!%p27_p2) target bundleno = 8 (0x8), region = 123 }
 0x8ba   :  { %2198 = vsyncpa [#allocation3], 1 }
 0x8bb   :  { %2200 = vsyncpa [#allocation3 + $0x1], 1 }

</bundles_post_ra>
